<compile_context>
chip_gen: v7x
topology: tpu7x:2x2x1
jax: 0.10.0
libtpu: 0.0.40
codegen_flags: <defaults>
</compile_context>

<pallas_src>
import jax
import jax.numpy as jnp
from jax.experimental import pallas as pl
from jax.experimental.pallas import tpu as pltpu

_LANE = 128
_TILE_M_CAP_CACHE = None


def _tile_m_cap():
    """Generation-aware cap on the batch tile (rows)."""
    global _TILE_M_CAP_CACHE
    if _TILE_M_CAP_CACHE is not None:
        return _TILE_M_CAP_CACHE
    cap = 8192  # safe default (v7x: 64 MiB per-TC VMEM, 32 MiB scoped budget)
    try:
        info = pltpu.get_tpu_info()
        vmem = int(getattr(info, "vmem_capacity_bytes", 0))
        if vmem >= (100 << 20):      # v5e / v6e: 128 MiB physical VMEM
            cap = 16384
    except Exception:
        pass
    _TILE_M_CAP_CACHE = cap
    return cap


def _round_up(v, m):
    return ((v + m - 1) // m) * m


def _make_mlp_kernel(n_dim, n_linear, mxu_dtype):
    """Build the kernel body for an MLP with `n_linear` Linear layers."""
    cast = (mxu_dtype != jnp.float32)

    def kernel(*refs):
        x_ref = refs[0]
        o_ref = refs[-1]
        wb = refs[1:-1]          # alternating (w_ref, b_ref), feature-major:
                                 #   w: (out, in), b: (out, 1)

        x = x_ref[...]           # (n_dim, TILE_M) -- batch on the lane axis

        # ---- layer 1 on the VPU: K = n_dim is tiny, broadcast FMAs (f32) ----
        w1 = wb[0][...]          # (h0, n_dim)
        h = wb[1][...]           # (h0, 1) bias, broadcasts across lanes
        for k in range(n_dim):   # static, unrolled at trace time
            h = h + w1[:, k:k + 1] * x[k:k + 1, :]
        h = jnp.tanh(h)          # EUP, f32

        # ---- hidden layers on the MXU: (h_out, h_in) @ (h_in, TILE_M) -------
        for l in range(1, n_linear - 1):
            w = wb[2 * l][...]
            b = wb[2 * l + 1][...]
            lhs = w.astype(mxu_dtype) if cast else w
            rhs = h.astype(mxu_dtype) if cast else h
            h = jnp.tanh(
                jnp.dot(lhs, rhs, preferred_element_type=jnp.float32) + b)

        # ---- output layer: (1, h_last) @ (h_last, TILE_M), lane-dense N -----
        wo = wb[2 * (n_linear - 1)][...]
        bo = wb[2 * (n_linear - 1) + 1][...]
        lhs = wo.astype(mxu_dtype) if cast else wo
        rhs = h.astype(mxu_dtype) if cast else h
        y = jnp.dot(lhs, rhs, preferred_element_type=jnp.float32) + bo
        o_ref[...] = y.astype(o_ref.dtype)                # (1, TILE_M)

    return kernel


def linear_pde_net_forward(x, params, *, tile_m=None, mxu_dtype=jnp.float32,
                           use_pallas=None, x_feature_major=False):
    """Forward pass of LinearPDENet with a batch-tiled, feature-major kernel.

    x:      (batch, n_dim) float32   (or (n_dim, batch) if x_feature_major)
    params: list of (w, b) pairs in PyTorch Linear order, w: (in, out), b: (out,)
    returns (batch, 1) float32
    """
    x = jnp.asarray(x, jnp.float32)
    if x_feature_major:
        n_dim, batch = x.shape
    else:
        batch, n_dim = x.shape

    n_linear = len(params)
    assert params[0][0].shape[0] == n_dim
    assert params[-1][0].shape[1] == 1

    # Small batches: the kernel would be pure pallas_call fixed cost; let the
    # fused XLA MLP handle it.
    if use_pallas is None:
        use_pallas = batch >= 1024
    if not use_pallas:
        x_bm = x.T if x_feature_major else x
        return reference_forward(x_bm, params)

    # ---- batch tiling ------------------------------------------------------
    if tile_m is None:
        # Target two grid steps (both v7x TensorCores busy), capped by a
        # generation-aware VMEM-safe tile size.
        tile_m = min(_tile_m_cap(),
                     max(_LANE, _round_up(-(-batch // 2), _LANE)))
    assert tile_m % _LANE == 0, "tile_m must be a multiple of 128 (lane width)"

    num_tiles = -(-batch // tile_m)
    if num_tiles > 1 and num_tiles % 2:
        # Even step count -> clean split across v7x's two TensorCores.
        num_tiles += 1
        tile_m = max(_LANE, _round_up(-(-batch // num_tiles), _LANE))
    padded = num_tiles * tile_m

    x_t = x if x_feature_major else x.T                  # (n_dim, batch)
    if padded != batch:
        x_t = jnp.pad(x_t, ((0, 0), (0, padded - batch)))
    grid = (num_tiles,)

    # Feature-major parameters: w -> (out, in), b -> (out, 1).
    flat_params = []
    for w, b in params:
        flat_params.append(jnp.asarray(w, jnp.float32).T)
        flat_params.append(jnp.asarray(b, jnp.float32).reshape(-1, 1))

    def full(shape):
        return pl.BlockSpec(shape, lambda i: (0, 0))     # resident every step

    in_specs = [pl.BlockSpec((n_dim, tile_m), lambda i: (0, i))]
    for p in flat_params:
        in_specs.append(full(p.shape))

    # Advisory cost estimate (tiny kernel inside a bigger jitted PINN loss).
    flops = 2 * padded * sum(int(w.shape[0]) * int(w.shape[1]) for w, _ in params)
    transc = padded * sum(int(w.shape[1]) for w, _ in params[:-1])
    bytes_acc = 4 * (padded * (n_dim + 1)
                     + sum(int(w.size) + int(b.size) for w, b in params))

    out = pl.pallas_call(
        _make_mlp_kernel(n_dim, n_linear, mxu_dtype),
        out_shape=jax.ShapeDtypeStruct((1, padded), jnp.float32),
        grid_spec=pltpu.PrefetchScalarGridSpec(
            num_scalar_prefetch=0,
            grid=grid,
            in_specs=in_specs,
            out_specs=pl.BlockSpec((1, tile_m), lambda i: (0, i)),  # lane-dense
        ),
        compiler_params=pltpu.CompilerParams(
            dimension_semantics=("parallel",),
            vmem_limit_bytes=32 * 1024 * 1024,   # safe on v5e/v6e/v7x
            # Let the wrapper-side transpose / weight re-layout fuse into the
            # pallas_call operands instead of separate HBM round-trips.
            allow_input_fusion=[True] * (1 + len(flat_params)),
        ),
        cost_estimate=pl.CostEstimate(
            flops=flops, transcendentals=transc, bytes_accessed=bytes_acc),
    )(x_t, *flat_params)

    return out[:, :batch].T                              # (batch, 1)


def init_params(key, n_dim, hidden_dims):
    """Deterministic synthetic init (uniform, PyTorch-Linear-like bounds)."""
    dims = [n_dim] + list(hidden_dims) + [1]
    params = []
    for fan_in, fan_out in zip(dims[:-1], dims[1:]):
        key, kw, kb = jax.random.split(key, 3)
        bound = 1.0 / (fan_in ** 0.5)
        w = jax.random.uniform(kw, (fan_in, fan_out), jnp.float32, -bound, bound)
        b = jax.random.uniform(kb, (fan_out,), jnp.float32, -bound, bound)
        params.append((w, b))
    return params


def reference_forward(x, params):
    """Pure-JAX reference of the same MLP (also the small-batch fast path)."""
    h = jnp.asarray(x, jnp.float32)
    for w, b in params[:-1]:
        h = jnp.tanh(h @ w + b)
    w, b = params[-1]
    return h @ w + b


if __name__ == "__main__":
    # Config implied by the module: n_dim spatial coords in, scalar PDE value out.
    n_dim = 2
    hidden_dims = [32, 32]

    key = jax.random.PRNGKey(0)
    key_x, key_p = jax.random.split(key)
    params = init_params(key_p, n_dim, hidden_dims)

    # (1) Main Pallas path: batch large enough to take the kernel path,
    #     auto tile -> 2 even grid steps (v7x megacore-friendly).
    batch = 4096
    x = jax.random.uniform(key_x, (batch, n_dim), jnp.float32, -1.0, 1.0)
    y = jax.block_until_ready(linear_pde_net_forward(x, params))
    y_ref = reference_forward(x, params)
    assert y.shape == (batch, 1)
    assert jnp.allclose(y, y_ref, atol=1e-5, rtol=1e-5), "f32 kernel mismatch"

    # (2) Ragged batch forced through the Pallas path (pad + slice, even tiles).
    xr = x[:2500]
    yr = jax.block_until_ready(
        linear_pde_net_forward(xr, params, use_pallas=True))
    assert yr.shape == (2500, 1)
    assert jnp.allclose(yr, reference_forward(xr, params),
                        atol=1e-5, rtol=1e-5), "ragged kernel mismatch"

    # (3) Small batch auto-dispatches to the plain XLA MLP (overhead regime).
    xs = x[:256]
    ys = jax.block_until_ready(linear_pde_net_forward(xs, params))
    assert ys.shape == (256, 1)
    assert jnp.allclose(ys, reference_forward(xs, params),
                        atol=1e-5, rtol=1e-5), "small-batch path mismatch"

    # (4) bf16-MXU variant (v5e/v6e perf option); looser tolerance by design.
    yb = jax.block_until_ready(
        linear_pde_net_forward(x, params, use_pallas=True,
                               mxu_dtype=jnp.bfloat16))
    assert yb.shape == (batch, 1)
    assert jnp.allclose(yb, y_ref, atol=5e-2, rtol=0.0), "bf16 kernel mismatch"

    # TODO(synk): physics_loss / train_net / prepare_gpu_data are host-side
    # training utilities (autograd + Adam loop, data staging) and are not part
    # of the forward-pass kernel.
    print("KERNEL_OK")
</pallas_src>

<mosaic_0001>
module attributes {stable_mosaic.version = 11 : i64} {
  func.func @kernel(%arg0: i32, %arg1: memref<2x2048xf32, #tpu.memory_space<vmem>>, %arg2: memref<32x2xf32, #tpu.memory_space<vmem>>, %arg3: memref<32x1xf32, #tpu.memory_space<vmem>>, %arg4: memref<32x32xf32, #tpu.memory_space<vmem>>, %arg5: memref<32x1xf32, #tpu.memory_space<vmem>>, %arg6: memref<1x32xf32, #tpu.memory_space<vmem>>, %arg7: memref<1x1xf32, #tpu.memory_space<vmem>>, %arg8: memref<1x2048xf32, #tpu.memory_space<vmem>>) attributes {dimension_semantics = [#tpu.dimension_semantics<parallel>], iteration_bounds = array<i64: 2>, scalar_prefetch = 0 : i64, scratch_operands = 0 : i64, tpu.core_type = #tpu.core_type<tc>, window_params = [{transform_indices = @transform_0, window_bounds = array<i64: 2, 2048>}, {pipeline_mode = #tpu.pipeline_mode<synchronous>, transform_indices = @transform_1, window_bounds = array<i64: 32, 2>}, {pipeline_mode = #tpu.pipeline_mode<synchronous>, transform_indices = @transform_2, window_bounds = array<i64: 32, 1>}, {pipeline_mode = #tpu.pipeline_mode<synchronous>, transform_indices = @transform_3, window_bounds = array<i64: 32, 32>}, {pipeline_mode = #tpu.pipeline_mode<synchronous>, transform_indices = @transform_4, window_bounds = array<i64: 32, 1>}, {pipeline_mode = #tpu.pipeline_mode<synchronous>, transform_indices = @transform_5, window_bounds = array<i64: 1, 32>}, {pipeline_mode = #tpu.pipeline_mode<synchronous>, transform_indices = @transform_6, window_bounds = array<i64: 1, 1>}, {transform_indices = @transform_7, window_bounds = array<i64: 1, 2048>}]} {
    %c0 = arith.constant 0 : index
    %c0_0 = arith.constant 0 : index
    %0 = vector.load %arg1[%c0, %c0_0] : memref<2x2048xf32, #tpu.memory_space<vmem>>, vector<2x2048xf32>
    %c0_1 = arith.constant 0 : index
    %c0_2 = arith.constant 0 : index
    %1 = vector.load %arg2[%c0_1, %c0_2] : memref<32x2xf32, #tpu.memory_space<vmem>>, vector<32x2xf32>
    %c0_3 = arith.constant 0 : index
    %c0_4 = arith.constant 0 : index
    %2 = vector.load %arg3[%c0_3, %c0_4] : memref<32x1xf32, #tpu.memory_space<vmem>>, vector<32x1xf32>
    %3 = vector.extract_strided_slice %1 {offsets = [0, 0], sizes = [32, 1], strides = [1, 1]} : vector<32x2xf32> to vector<32x1xf32>
    %4 = vector.extract_strided_slice %0 {offsets = [0, 0], sizes = [1, 2048], strides = [1, 1]} : vector<2x2048xf32> to vector<1x2048xf32>
    %5 = vector.broadcast %3 : vector<32x1xf32> to vector<32x2048xf32>
    %6 = vector.broadcast %4 : vector<1x2048xf32> to vector<32x2048xf32>
    %7 = arith.mulf %5, %6 : vector<32x2048xf32>
    %8 = vector.broadcast %2 : vector<32x1xf32> to vector<32x2048xf32>
    %9 = arith.addf %8, %7 : vector<32x2048xf32>
    %10 = vector.extract_strided_slice %1 {offsets = [0, 1], sizes = [32, 1], strides = [1, 1]} : vector<32x2xf32> to vector<32x1xf32>
    %11 = vector.extract_strided_slice %0 {offsets = [1, 0], sizes = [1, 2048], strides = [1, 1]} : vector<2x2048xf32> to vector<1x2048xf32>
    %12 = vector.broadcast %10 : vector<32x1xf32> to vector<32x2048xf32>
    %13 = vector.broadcast %11 : vector<1x2048xf32> to vector<32x2048xf32>
    %14 = arith.mulf %12, %13 : vector<32x2048xf32>
    %15 = arith.addf %9, %14 : vector<32x2048xf32>
    %16 = math.tanh %15 : vector<32x2048xf32>
    %c0_5 = arith.constant 0 : index
    %c0_6 = arith.constant 0 : index
    %17 = vector.load %arg4[%c0_5, %c0_6] : memref<32x32xf32, #tpu.memory_space<vmem>>, vector<32x32xf32>
    %c0_7 = arith.constant 0 : index
    %c0_8 = arith.constant 0 : index
    %18 = vector.load %arg5[%c0_7, %c0_8] : memref<32x1xf32, #tpu.memory_space<vmem>>, vector<32x1xf32>
    %cst = arith.constant dense<0.000000e+00> : vector<32x2048xf32>
    %19 = tpu.matmul %17, %16, %cst {dimension_numbers = #tpu.dot_dimension_numbers<[1], [0], [0], [1], [0, 0, 1, 1], [], []>} : vector<32x32xf32>, vector<32x2048xf32>, vector<32x2048xf32> -> vector<32x2048xf32>
    %20 = vector.broadcast %18 : vector<32x1xf32> to vector<32x2048xf32>
    %21 = arith.addf %19, %20 : vector<32x2048xf32>
    %22 = math.tanh %21 : vector<32x2048xf32>
    %c0_9 = arith.constant 0 : index
    %c0_10 = arith.constant 0 : index
    %23 = vector.load %arg6[%c0_9, %c0_10] : memref<1x32xf32, #tpu.memory_space<vmem>>, vector<1x32xf32>
    %c0_11 = arith.constant 0 : index
    %c0_12 = arith.constant 0 : index
    %24 = vector.load %arg7[%c0_11, %c0_12] : memref<1x1xf32, #tpu.memory_space<vmem>>, vector<1x1xf32>
    %cst_13 = arith.constant dense<0.000000e+00> : vector<1x2048xf32>
    %25 = tpu.matmul %23, %22, %cst_13 {dimension_numbers = #tpu.dot_dimension_numbers<[1], [0], [0], [1], [0, 0, 1, 1], [], []>} : vector<1x32xf32>, vector<32x2048xf32>, vector<1x2048xf32> -> vector<1x2048xf32>
    %26 = vector.broadcast %24 : vector<1x1xf32> to vector<1x2048xf32>
    %27 = arith.addf %25, %26 : vector<1x2048xf32>
    %c0_14 = arith.constant 0 : index
    %c0_15 = arith.constant 0 : index
    %28 = vector.load %arg8[%c0_14, %c0_15] : memref<1x2048xf32, #tpu.memory_space<vmem>>, vector<1x2048xf32>
    tpu.vector_store %arg8[%c0_14, %c0_15], %27 {strides = array<i32>} : memref<1x2048xf32, #tpu.memory_space<vmem>>, vector<1x2048xf32>,
    return
  }
  func.func @transform_0(%arg0: i32) -> (i32, i32) {
    %c0_i32 = arith.constant 0 : i32
    %c0_i32_0 = arith.constant 0 : i32
    return %c0_i32, %arg0 : i32, i32
  }
  func.func @transform_1(%arg0: i32) -> (i32, i32) {
    %c0_i32 = arith.constant 0 : i32
    %c0_i32_0 = arith.constant 0 : i32
    %c0_i32_1 = arith.constant 0 : i32
    return %c0_i32, %c0_i32_0 : i32, i32
  }
  func.func @transform_2(%arg0: i32) -> (i32, i32) {
    %c0_i32 = arith.constant 0 : i32
    %c0_i32_0 = arith.constant 0 : i32
    %c0_i32_1 = arith.constant 0 : i32
    return %c0_i32, %c0_i32_0 : i32, i32
  }
  func.func @transform_3(%arg0: i32) -> (i32, i32) {
    %c0_i32 = arith.constant 0 : i32
    %c0_i32_0 = arith.constant 0 : i32
    %c0_i32_1 = arith.constant 0 : i32
    return %c0_i32, %c0_i32_0 : i32, i32
  }
  func.func @transform_4(%arg0: i32) -> (i32, i32) {
    %c0_i32 = arith.constant 0 : i32
    %c0_i32_0 = arith.constant 0 : i32
    %c0_i32_1 = arith.constant 0 : i32
    return %c0_i32, %c0_i32_0 : i32, i32
  }
  func.func @transform_5(%arg0: i32) -> (i32, i32) {
    %c0_i32 = arith.constant 0 : i32
    %c0_i32_0 = arith.constant 0 : i32
    %c0_i32_1 = arith.constant 0 : i32
    return %c0_i32, %c0_i32_0 : i32, i32
  }
  func.func @transform_6(%arg0: i32) -> (i32, i32) {
    %c0_i32 = arith.constant 0 : i32
    %c0_i32_0 = arith.constant 0 : i32
    %c0_i32_1 = arith.constant 0 : i32
    return %c0_i32, %c0_i32_0 : i32, i32
  }
  func.func @transform_7(%arg0: i32) -> (i32, i32) {
    %c0_i32 = arith.constant 0 : i32
    %c0_i32_0 = arith.constant 0 : i32
    return %c0_i32, %arg0 : i32, i32
  }
}

</mosaic_0001>

<bundles_post_ra>
// kernel: tpu_custom_call.1
= control target key start
LH: loop header
LB: loop body
LE: loop exit
PB: predicated region body
PF: predicated region fallthrough
CT: control target
= control target key end

     0   :  { %s4050_s0 = inlined_call_operand.vmem [shape: f32[2,4096], index: 0, kind: input, shape index: {}]   ;;  %s4051_s1 = inlined_call_operand.vmem [shape: f32[32,2], index: 1, kind: input, shape index: {}]   ;;  %s4052_s2 = inlined_call_operand.vmem [shape: f32[32,1], index: 2, kind: input, shape index: {}]   ;;  %s4053_s3 = inlined_call_operand.vmem [shape: f32[32,32], index: 3, kind: input, shape index: {}]   ;;  %s4054_s4 = inlined_call_operand.vmem [shape: f32[32,1], index: 4, kind: input, shape index: {}]   ;;  %s4055_s5 = inlined_call_operand.vmem [shape: f32[1,32], index: 5, kind: input, shape index: {}]   ;;  %s4056_s6 = inlined_call_operand.<no memory space> [shape: f32[1,1], index: 6, kind: input, shape index: {}]   ;;  %s4057_s7 = inlined_call_operand.hbm [shape: f32[1,4096], index: 7, kind: output, shape index: {}]  }
   0x1   :  { %v12_v0 = vstv %s4056_s6 }
   0x2   :  { %13 = vst [vmem:[#allocation2] sm:$0x1] %v12_v0 }
   0x3   :  { %14 = vsyncpa [#allocation4], 0 }
   0x4   :  { %16 = vsyncpa [#allocation4 + $0x1], 0  ;;  %s3153_s26 = smov 0   ;;  %s3155_s27 = smov 0  }
   0x5   :  { %s3157_s28 = smov 0   ;;  %s3159_s29 = smov 0  }
   0x6 LB: > { %s3174_s6 = sadd.s32 4294967295, %s3103_s29   ;;  %s2553_s30 = sadd.s32 4294967294, %s3103_s29   ;;  %s3103_s29 = sphi %s3159_s29, %s4111_s29   ;;  %s3099_s28 = sphi %s3157_s28, %s4110_s28   ;;  %s3095_s27 = sphi %s3155_s27, %s4109_s27   ;;  %s3091_s26 = sphi %s3153_s26, %s4108_s26  }
   0x7   : > { %s3178_s8 = sadd.s32 1, %s3103_s29   ;;  %s181_s9 = sadd.s32 1, %s3099_s28 }
   0x8   : > { %s178_s10 = ssub.s32 %s3103_s29, %s3178_s8  ;;  %p191_p0 = scmp.ne.s32.totalorder %s3099_s28, %s3095_s27 }
   0x9   : > { %p179_p1 = scmp.eq.s32.totalorder %s178_s10, 0  ;;  %p192_p2 = scmp.eq.s32.totalorder %s3174_s6, 1 }
   0xa   : > { %p197_p3 = scmp.ne.s32.totalorder %s3095_s27, %s3091_s26  ;;  %p198_p4 = scmp.eq.s32.totalorder %s2553_s30, 1 }
   0xb   : > { %s3189_s11 = scalar_select %p179_p1, %s3099_s28, %s181_s9  }
   0xc   : > { %p3191_p5 = por %p192_p2, %p191_p0  ;;  %p3195_p6 = por %p198_p4, %p197_p3 }
   0xd   : > { %p2556_p7 = scmp.ge.s32.totalorder %s3103_s29, 1  ;;  %p243_p8 = scmp.lt.s32.totalorder %s3103_s29, 3 }
   0xf   : > { %p244_p9 = pnand %p2556_p7, %p243_p8 }
  0x11   : > { %247 = sbr.rel (%p244_p9) target bundleno = 743 (0x2e7), region = 48 }
  0x18   : > { %v290_v1 = vld [vmem:[%s4052_s2] sm:$0xff]  ;;  %v3105_v3 = vmov 0   ;;  %v291_v4 = vld [vmem:[%s4052_s2 + $0x8] sm:$0xff]  ;;  %v289_v6 = vld [vmem:[%s4051_s1 + $0x18] sm:$0xff]  ;;  %v3106_v7 = vmov 1   ;;  %v4058_v11 = vmov 0.0   ;;  %v318_v12 = vlaneseq }
  0x19   : > { %v286_v2 = vld [vmem:[%s4051_s1] sm:$0xff]  ;;  %2778 = vset.pattern.permute.xlu1 %v3105_v3  ;;  %2777 = vset.pattern.permute.xlu0 %v3105_v3  ;;  %v287_v5 = vld [vmem:[%s4051_s1 + $0x8] sm:$0xff]  ;;  %v288_v8 = vld [vmem:[%s4051_s1 + $0x10] sm:$0xff]  ;;  %s2558_s15 = sshll.u32 %s3174_s6, 4  ;;  %vm990_vm0 = vcmask 261120   ;;  %s272_s23 = sand.u32 1, %s3095_s27  }
  0x1a   : > { %528 = vperm.xlu1 %2778, %v290_v1   ;;  %296 = vperm.xlu0 %2777, %v286_v2   ;;  %v292_v9 = vld [vmem:[%s4052_s2 + $0x10] sm:$0xff]  ;;  %v293_v10 = vld [vmem:[%s4052_s2 + $0x18] sm:$0xff]  ;;  %p276_p10 = scmp.lt.s32.totalorder %s2558_s15, 31  ;;  %v3228_v13 = vshrl.u32 %v318_v12, 7  ;;  %v966_v60 = vld [vmem:[%s4054_s4] sm:$0xff]  ;;  %s2557_s24 = sshll.u32 %s272_s23, 4 }
  0x1b   : > { %1067 = vmatprep.mubr.f32.mxu0 %v4058_v11  ;;  %1156 = vmatprep.mubr.f32.mxu1 %v4058_v11  ;;  %v967_v61 = vld [vmem:[%s4054_s4 + $0x8] sm:$0xff]  ;;  %s3997_s25 = scalar_lea.vmem [#allocation3], %s2557_s24  ;;  %s2605_s30 = sshll.u32 %s3174_s6, 8 }
  0x1c   : > { %s4113_s15 = smov (!%p276_p10, %s2558_s15), 31  ;;  %4077 = vst [vmem:[#allocation6_spill] sm:$0xff] %v3228_v13  ;;  %v3236_v14 = vsub.s32 2, %v3228_v13  ;;  %v3240_v16 = vsub.s32 3, %v3228_v13  ;;  %v3243_v17 = vsub.s32 0, %v3228_v13  ;;  %v3246_v18 = vsub.s32 1, %v3228_v13 }
  0x1d   : > { %s2559_s16 = sshll.u32 %s4113_s15, 1  ;;  %v3249_v19 = vsub.s32 6, %v3228_v13  ;;  %v3252_v20 = vsub.s32 7, %v3228_v13  ;;  %v3256_v22 = vsub.s32 4, %v3228_v13  ;;  %v3259_v23 = vsub.s32 5, %v3228_v13  ;;  %s2494_s9 = sshll.u32 %s3997_s25, 4  ;;  %s4007_s9 = int_to_ptr.vmem [resolvable:$true] %s2494_s9 }
  0x1e   : > { %533 = vperm.xlu1 %2778, %v291_v4   ;;  %301 = vperm.xlu0 %2777, %v287_v5   ;;  %s3233_s19 = scalar_lea.vmem %s4050_s0, %s2559_s16  ;;  %4078 = vst [vmem:[#allocation7_spill] sm:$0xff] %v3243_v17  ;;  %s4005_s15 = scalar_lea.hbm %s4057_s7, %s2605_s30 }
  0x1f   : > { %v282_v15 = vld [vmem:[%s3233_s19] sm:$0xff]  ;;  %v283_v24 = vld [vmem:[%s3233_s19 + $0x8] sm:$0xff]  ;;  %v284_v30 = vld [vmem:[%s3233_s19 + $0x10] sm:$0xff]  ;;  %s2480_s16 = scalar_lea.sflag [#allocation4], %s272_s23  ;;  %s3041_s17 = scalar_lea.vmem %s4007_s9, 256 }
  0x20   : > { %v325_v21 = vrot.slane %v282_v15, %v3236_v14  ;;  %v633_v25 = vrot.slane %v282_v15, %v3240_v16  ;;  %v333_v26 = vrot.slane %v282_v15, %v3249_v19  ;;  %v641_v27 = vrot.slane %v282_v15, %v3252_v20  ;;  %v285_v55 = vld [vmem:[%s3233_s19 + $0x18] sm:$0xff]  ;;  %p3042_p11 = scmp.ne.s32.totalorder %s4007_s9, %s3041_s17  ;;  %s3109_s6 = smov [#allocation3]  }
  0x21   : > { %v321_v28 = vrot.slane %v282_v15, %v3243_v17  ;;  %v629_v29 = vrot.slane %v282_v15, %v3246_v18  ;;  %v329_v32 = vrot.slane %v282_v15, %v3256_v22  ;;  %v637_v33 = vrot.slane %v282_v15, %v3259_v23  ;;  %s3045_s18 = sshll.u32 %s3109_s6, 4  ;;  %s3046_s18 = int_to_ptr.vmem [resolvable:$false] %s3045_s18 }
  0x22   : > { %2779 = vset.pattern.permute.xlu1 %v3106_v7  ;;  %311 = vperm.xlu0 %2777, %v289_v6   ;;  %v3269_v31 = vrot.slane %v325_v21, %v3243_v17  ;;  %v341_v34 = vrot.slane %v283_v24, %v3236_v14  ;;  %v649_v35 = vrot.slane %v283_v24, %v3240_v16  ;;  %p3043_p12 = pnand %p3042_p11, %p3191_p5  ;;  %s3047_s19 = scalar_lea.vmem %s3046_s18, 512 }
  0x23   : > { %615 = vperm.xlu1 %2779, %v287_v5   ;;  %v349_v36 = vrot.slane %v283_v24, %v3249_v19  ;;  %v657_v37 = vrot.slane %v283_v24, %v3252_v20  ;;  %v337_v38 = vrot.slane %v283_v24, %v3243_v17  ;;  %v645_v39 = vrot.slane %v283_v24, %v3246_v18  ;;  %v968_v5 = vld [vmem:[%s4054_s4 + $0x10] sm:$0xff]  ;;  %p3048_p0 = scmp.lt.s32.totalorder %s4007_s9, %s3046_s18  ;;  %p3049_p1 = scmp.lt.s32.totalorder %s3047_s19, %s3041_s17 }
  0x24   : > { %v345_v40 = vrot.slane %v283_v24, %v3256_v22  ;;  %v653_v41 = vrot.slane %v283_v24, %v3259_v23  ;;  %v357_v42 = vrot.slane %v284_v30, %v3236_v14  ;;  %v3283_v43 = vrot.slane %v633_v25, %v3246_v18  ;;  %p3044_p13 = pneg %p3043_p12 }
  0x25   : > { %v3286_v44 = vrot.slane %v333_v26, %v3243_v17  ;;  %v3289_v45 = vrot.slane %v641_v27, %v3246_v18  ;;  %v3292_v46 = vrot.slane %v321_v28, %v3243_v17  ;;  %v3295_v47 = vrot.slane %v629_v29, %v3246_v18  ;;  %v969_v26 = vld [vmem:[%s4054_s4 + $0x18] sm:$0xff]  ;;  %p3050_p2 = por %p3049_p1, %p3048_p0 }
  0x26   : > { %2781 = vset.pattern.permute.xlu0 %v3106_v7  ;;  %v3298_v48 = vrot.slane %v329_v32, %v3243_v17  ;;  %v3301_v49 = vrot.slane %v637_v33, %v3246_v18  ;;  %v3304_v50 = vrot.slane %v341_v34, %v3243_v17  ;;  %v3307_v51 = vrot.slane %v649_v35, %v3246_v18 }
  0x27   : > { %2780 = vset.pattern.permute.xlu1 %v3105_v3  ;;  %611 = vperm.xlu0 %2781, %v286_v2   ;;  %v3310_v52 = vrot.slane %v349_v36, %v3243_v17  ;;  %v3313_v53 = vrot.slane %v657_v37, %v3246_v18  ;;  %v3316_v54 = vrot.slane %v337_v38, %v3243_v17  ;;  %p3051_p3 = pnand %p3050_p2, %p3044_p13 }
  0x28   : > { %306 = vperm.xlu1 %2780, %v288_v8   ;;  %v3320_v56 = vrot.slane %v645_v39, %v3246_v18  ;;  %v3323_v57 = vrot.slane %v345_v40, %v3243_v17  ;;  %v3326_v58 = vrot.slane %v653_v41, %v3246_v18  ;;  %v3329_v59 = vrot.slane %v357_v42, %v3243_v17 }
  0x29   : > { %v365_v62 = vrot.slane %v284_v30, %v3249_v19  ;;  %v353_v63 = vrot.slane %v284_v30, %v3243_v17  ;;  %v361_v0 = vrot.slane %v284_v30, %v3256_v22  ;;  %v665_v1 = vrot.slane %v284_v30, %v3240_v16 }
  0x2a   : > { %v673_v2 = vrot.slane %v284_v30, %v3252_v20  ;;  %v373_v4 = vrot.slane %v285_v55, %v3236_v14  ;;  %v681_v12 = vrot.slane %v285_v55, %v3240_v16  ;;  %v689_v15 = vrot.slane %v285_v55, %v3252_v20 }
  0x2b   : > { %619 = vperm.xlu0 %2781, %v288_v8   ;;  %v381_v8 = vrot.slane %v285_v55, %v3249_v19  ;;  %v677_v21 = vrot.slane %v285_v55, %v3246_v18  ;;  %v685_v14 = vrot.slane %v285_v55, %v3259_v23  ;;  %v3356_v24 = vrot.slane %v365_v62, %v3243_v17 }
  0x2c   : > { %538 = vperm.xlu1 %2780, %v292_v9   ;;  %v369_v9 = vrot.slane %v285_v55, %v3243_v17  ;;  %v3359_v25 = vrot.slane %v353_v63, %v3243_v17  ;;  %v3362_v19 = vrot.slane %v361_v0, %v3243_v17  ;;  %v3368_v16 = vrot.slane %v673_v2, %v3246_v18 }
  0x2d   : > { %v3383_v28 = vrot.slane %v381_v8, %v3243_v17  ;;  %v3396_v34 = vrot.slane %v681_v12, %v3246_v18  ;;  %v3399_v35 = vrot.slane %v689_v15, %v3246_v18  ;;  %v3402_v36 = vrot.slane %v677_v21, %v3246_v18 }
  0x2e   : > { %4079 = vst [vmem:[#allocation8_spill] sm:$0xff] %v3359_v25  ;;  %4080 = vst [vmem:[#allocation9_spill] sm:$0xff] %v3362_v19  ;;  %v3386_v29 = vrot.slane %v369_v9, %v3243_v17  ;;  %v3405_v37 = vrot.slane %v685_v14, %v3246_v18 }
  0x2f   : > { %2784 = vset.pattern.permute.xlu0 %v3105_v3  ;;  %4081 = vst [vmem:[#allocation10_spill] sm:$0xff] %v3368_v16  ;;  %4085 = vst [vmem:[#allocation14_spill] sm:$0xff] %v3383_v28 }
  0x30   : > { %543 = vperm.xlu1 %2780, %v293_v10   ;;  %977 = vperm.xlu0 %2784, %v967_v61   ;;  %v377_v10 = vrot.slane %v285_v55, %v3256_v22  ;;  %v3365_v22 = vrot.slane %v665_v1, %v3246_v18  ;;  %4086 = vst [vmem:[#allocation15_spill] sm:$0xff] %v3386_v29  ;;  %4088 = vst [vmem:[#allocation17_spill] sm:$0xff] %v3396_v34 }
  0x31   : > { %4089 = vst [vmem:[#allocation18_spill] sm:$0xff] %v3399_v35  ;;  %4090 = vst [vmem:[#allocation19_spill] sm:$0xff] %v3402_v36 }
  0x32   : > { %4091 = vst [vmem:[#allocation20_spill] sm:$0xff] %v3405_v37 }
  0x34   : > { %2782 = vset.pattern.permute.xlu1 %v3106_v7  ;;  %v669_v7 = vrot.slane %v284_v30, %v3259_v23  ;;  %v3374_v23 = vrot.slane %v373_v4, %v3243_v17 }
  0x35   : > { %623 = vperm.xlu1 %2782, %v289_v6   ;;  %v1780_v6 = vld [vmem:[#allocation2] sm:$0x1] }
  0x36   : > { %1783 = vperm.xlu0 %2784, %v1780_v6   ;;  %4083 = vst [vmem:[#allocation12_spill] sm:$0xff] %v3374_v23  ;;  %v3380_v27 = vrot.slane %v669_v7, %v3246_v18 }
  0x38   : > { %4084 = vst [vmem:[#allocation13_spill] sm:$0xff] %v3380_v27 }
  0x39   : > { %2783 = vset.pattern.permute.xlu1 %v3105_v3  ;;  %v661_v3 = vrot.slane %v284_v30, %v3246_v18  ;;  %v3389_v30 = vrot.slane %v377_v10, %v3243_v17 }
  0x3a   : > { %972 = vperm.xlu1 %2783, %v966_v60  }
  0x3b   : > { %v3371_v20 = vrot.slane %v661_v3, %v3246_v18  ;;  %4087 = vst [vmem:[#allocation16_spill] sm:$0xff] %v3389_v30 }
  0x3d   : > { %4082 = vst [vmem:[#allocation11_spill] sm:$0xff] %v3371_v20 }
  0x3e   : > { %982 = vperm.xlu1 %2783, %v968_v5  }
  0x42   : > { %987 = vperm.xlu1 %2783, %v969_v26  }
  0x99   : > { %v3391_v32 = vpop.permute.xlu1 %528  ;;  %v3393_v33 = vpop.permute.xlu0 %296 }
  0x9a   : > { %v463_v38 = vmul.f32 %v3269_v31, %v3393_v33  ;;  %v465_v39 = vmul.f32 %v3286_v44, %v3393_v33  ;;  %v462_v40 = vmul.f32 %v3292_v46, %v3393_v33  ;;  %v464_v41 = vmul.f32 %v3298_v48, %v3393_v33 }
  0x9b   : > { %v467_v42 = vmul.f32 %v3304_v50, %v3393_v33  ;;  %v469_v18 = vmul.f32 %v3310_v52, %v3393_v33  ;;  %v466_v55 = vmul.f32 %v3316_v54, %v3393_v33  ;;  %v468_v60 = vmul.f32 %v3323_v57, %v3393_v33 }
  0x9c   : > { %v547_v61 = vadd.f32 %v3391_v32, %v463_v38  ;;  %v549_v62 = vadd.f32 %v3391_v32, %v465_v39  ;;  %v546_v63 = vadd.f32 %v3391_v32, %v462_v40  ;;  %v548_v0 = vadd.f32 %v3391_v32, %v464_v41 }
  0x9d   : > { %v3427_v1 = vpop.permute.xlu1 %533  ;;  %v3429_v2 = vpop.permute.xlu0 %301  ;;  %v3432_v3 = vadd.f32 %v3391_v32, %v467_v42  ;;  %v3435_v4 = vadd.f32 %v3391_v32, %v469_v18  ;;  %v3438_v5 = vadd.f32 %v3391_v32, %v466_v55  ;;  %v3441_v6 = vadd.f32 %v3391_v32, %v468_v60 }
  0x9e   : > { %v479_v7 = vmul.f32 %v3269_v31, %v3429_v2  ;;  %v481_v8 = vmul.f32 %v3286_v44, %v3429_v2  ;;  %v478_v9 = vmul.f32 %v3292_v46, %v3429_v2  ;;  %v480_v10 = vmul.f32 %v3298_v48, %v3429_v2 }
  0x9f   : > { %v483_v12 = vmul.f32 %v3304_v50, %v3429_v2  ;;  %v485_v15 = vmul.f32 %v3310_v52, %v3429_v2  ;;  %v482_v21 = vmul.f32 %v3316_v54, %v3429_v2  ;;  %v484_v14 = vmul.f32 %v3323_v57, %v3429_v2 }
  0xa0   : > { %v563_v26 = vadd.f32 %v3427_v1, %v479_v7  ;;  %v565_v38 = vadd.f32 %v3427_v1, %v481_v8  ;;  %v562_v39 = vadd.f32 %v3427_v1, %v478_v9  ;;  %v564_v40 = vadd.f32 %v3427_v1, %v480_v10 }
  0xa1   : > { %v3463_v41 = vpop.permute.xlu0 %311  ;;  %v567_v42 = vadd.f32 %v3427_v1, %v483_v12  ;;  %v569_v18 = vadd.f32 %v3427_v1, %v485_v15  ;;  %v566_v55 = vadd.f32 %v3427_v1, %v482_v21  ;;  %v568_v60 = vadd.f32 %v3427_v1, %v484_v14 }
  0xa2   : > { %v3469_v11 = vpop.permute.xlu1 %615  ;;  %v511_v7 = vmul.f32 %v3269_v31, %v3463_v41  ;;  %v513_v8 = vmul.f32 %v3286_v44, %v3463_v41  ;;  %v510_v9 = vmul.f32 %v3292_v46, %v3463_v41  ;;  %v3479_v10 = vmul.f32 %v3298_v48, %v3463_v41 }
  0xa3   : > { %v787_v12 = vmul.f32 %v3283_v43, %v3469_v11  ;;  %v789_v15 = vmul.f32 %v3289_v45, %v3469_v11  ;;  %v786_v21 = vmul.f32 %v3295_v47, %v3469_v11  ;;  %v788_v14 = vmul.f32 %v3301_v49, %v3469_v11 }
  0xa4   : > { %v791_v13 = vmul.f32 %v3307_v51, %v3469_v11  ;;  %v793_v17 = vmul.f32 %v3313_v53, %v3469_v11  ;;  %v790_v37 = vmul.f32 %v3320_v56, %v3469_v11  ;;  %v792_v30 = vmul.f32 %v3326_v58, %v3469_v11 }
  0xa5   : > { %v851_v36 = vadd.f32 %v787_v12, %v563_v26  ;;  %v853_v29 = vadd.f32 %v789_v15, %v565_v38  ;;  %v850_v35 = vadd.f32 %v786_v21, %v562_v39  ;;  %v852_v28 = vadd.f32 %v788_v14, %v564_v40 }
  0xa6   : > { %v3497_v34 = vpop.permute.xlu0 %611  ;;  %v855_v23 = vadd.f32 %v791_v13, %v567_v42  ;;  %v3499_v27 = vadd.f32 %v793_v17, %v569_v18  ;;  %v3501_v19 = vadd.f32 %v790_v37, %v566_v55  ;;  %v3503_v20 = vadd.f32 %v792_v30, %v568_v60 }
  0xa7   : > { %v3505_v25 = vpop.permute.xlu1 %306  ;;  %v771_v16 = vmul.f32 %v3283_v43, %v3497_v34  ;;  %2785 = vtanh.f32 %v851_v36  ;;  %v773_v26 = vmul.f32 %v3289_v45, %v3497_v34  ;;  %v770_v38 = vmul.f32 %v3295_v47, %v3497_v34 }
  0xa8   : > { %2787 = vtanh.f32 %v853_v29  ;;  %v772_v13 = vmul.f32 %v3301_v49, %v3497_v34  ;;  %v495_v17 = vmul.f32 %v3269_v31, %v3505_v25  ;;  %v497_v30 = vmul.f32 %v3286_v44, %v3505_v25 }
  0xa9   : > { %v835_v37 = vadd.f32 %v771_v16, %v547_v61  ;;  %v837_v39 = vadd.f32 %v773_v26, %v549_v62  ;;  %v834_v40 = vadd.f32 %v770_v38, %v546_v63  ;;  %2789 = vtanh.f32 %v850_v35 }
  0xaa   : > { %v3519_v36 = vpop.permute.xlu0 %619  ;;  %v836_v42 = vadd.f32 %v772_v13, %v548_v0  ;;  %2791 = vtanh.f32 %v852_v28  ;;  %v494_v29 = vmul.f32 %v3292_v46, %v3505_v25  ;;  %v496_v18 = vmul.f32 %v3298_v48, %v3505_v25 }
  0xab   : > { %v3525_v55 = vpop.permute.xlu1 %538  ;;  %2793 = vtanh.f32 %v835_v37  ;;  %v803_v31 = vmul.f32 %v3283_v43, %v3519_v36  ;;  %v805_v44 = vmul.f32 %v3289_v45, %v3519_v36  ;;  %v802_v16 = vmul.f32 %v3295_v47, %v3519_v36 }
  0xac   : > { %2795 = vtanh.f32 %v837_v39  ;;  %v579_v28 = vadd.f32 %v3525_v55, %v495_v17  ;;  %v581_v46 = vadd.f32 %v3525_v55, %v497_v30  ;;  %v578_v35 = vadd.f32 %v3525_v55, %v494_v29 }
  0xad   : > { %2797 = vtanh.f32 %v834_v40  ;;  %v580_v48 = vadd.f32 %v3525_v55, %v496_v18  ;;  %v804_v61 = vmul.f32 %v3301_v49, %v3519_v36  ;;  %v775_v62 = vmul.f32 %v3307_v51, %v3497_v34 }
  0xae   : > { %2799 = vtanh.f32 %v836_v42  ;;  %v867_v63 = vadd.f32 %v803_v31, %v579_v28  ;;  %v869_v0 = vadd.f32 %v805_v44, %v581_v46  ;;  %v866_v60 = vadd.f32 %v802_v16, %v578_v35 }
  0xaf   : > { %v3541_v12 = vpop.permute.xlu1 %543  ;;  %v868_v15 = vadd.f32 %v804_v61, %v580_v48  ;;  %v839_v21 = vadd.f32 %v775_v62, %v3432_v3  ;;  %2801 = vtanh.f32 %v855_v23  ;;  %v777_v14 = vmul.f32 %v3313_v53, %v3497_v34 }
  0xb0   : > { %v595_v26 = vadd.f32 %v3541_v12, %v511_v7  ;;  %2803 = vtanh.f32 %v867_v63  ;;  %v597_v38 = vadd.f32 %v3541_v12, %v513_v8  ;;  %v594_v13 = vadd.f32 %v3541_v12, %v510_v9 }
  0xb1   : > { %v2786_v17 = vpop.eup %2785  ;;  %2805 = vtanh.f32 %v869_v0  ;;  %v596_v30 = vadd.f32 %v3541_v12, %v3479_v10  ;;  %v841_v37 = vadd.f32 %v777_v14, %v3435_v4  ;;  %v774_v23 = vmul.f32 %v3320_v56, %v3497_v34 }
  0xb2   : > { %v2788_v3 = vpop.eup %2787  ;;  %2807 = vtanh.f32 %v866_v60  ;;  %v776_v7 = vmul.f32 %v3326_v58, %v3497_v34  ;;  %v499_v8 = vmul.f32 %v3304_v50, %v3505_v25  ;;  %v515_v9 = vmul.f32 %v3304_v50, %v3463_v41 }
  0xb3   : > { %v2790_v39 = vpop.eup %2789  ;;  %2809 = vtanh.f32 %v868_v15  ;;  %v838_v10 = vadd.f32 %v774_v23, %v3438_v5  ;;  %v807_v4 = vmul.f32 %v3307_v51, %v3519_v36  ;;  %v501_v40 = vmul.f32 %v3310_v52, %v3505_v25 }
  0xb4   : > { %v2792_v42 = vpop.eup %2791  ;;  %v3565_v29 = vpop.permute.xlu1 %623  ;;  %2811 = vtanh.f32 %v839_v21  ;;  %v840_v18 = vadd.f32 %v776_v7, %v3441_v6  ;;  %v583_v31 = vadd.f32 %v3525_v55, %v499_v8  ;;  %v599_v50 = vadd.f32 %v3541_v12, %v515_v9 }
  0xb5   : > { %v2794_v44 = vpop.eup %2793  ;;  %v819_v5 = vmul.f32 %v3283_v43, %v3565_v29  ;;  %v821_v16 = vmul.f32 %v3289_v45, %v3565_v29  ;;  %v818_v28 = vmul.f32 %v3295_v47, %v3565_v29  ;;  %v820_v46 = vmul.f32 %v3301_v49, %v3565_v29 }
  0xb6   : > { %v2796_v35 = vpop.eup %2795  ;;  %v2606_v48 = vpack.c.bf16 %v2786_v17, %v2794_v44  ;;  %2813 = vtanh.f32 %v841_v37  ;;  %v823_v6 = vmul.f32 %v3307_v51, %v3565_v29  ;;  %v871_v61 = vadd.f32 %v807_v4, %v583_v31 }
  0xb7   : > { %v2798_v62 = vpop.eup %2797  ;;  %v2614_v63 = vpack.c.bf16 %v2788_v3, %v2796_v35  ;;  %v883_v0 = vadd.f32 %v819_v5, %v595_v26  ;;  %v885_v43 = vadd.f32 %v821_v16, %v597_v38  ;;  %v882_v60 = vadd.f32 %v818_v28, %v594_v13 }
  0xb8   : > { %v2800_v15 = vpop.eup %2799  ;;  %2607 = vmatprep.subr.bf16.mxu0 %v2606_v48  ;;  %v2608_v45 = vpack.c.bf16 %v2790_v39, %v2798_v62  ;;  %v884_v21 = vadd.f32 %v820_v46, %v596_v30  ;;  %2815 = vtanh.f32 %v3499_v27  ;;  %v887_v47 = vadd.f32 %v823_v6, %v599_v50 }
  0xb9   : > { %v3581_v49 = vpop.eup %2801  ;;  %2615 = vmatprep.subr.bf16.mxu1 %v2614_v63  ;;  %v2616_v14 = vpack.c.bf16 %v2792_v42, %v2800_v15  ;;  %2817 = vtanh.f32 %v883_v0  ;;  %v517_v51 = vmul.f32 %v3310_v52, %v3463_v41  ;;  %v585_v17 = vadd.f32 %v3525_v55, %v501_v40 }
  0xba   : > { %v2804_v26 = vpop.eup %2803  ;;  %2609 = vmatpush1.bf16.msra.mxu0 %v2608_v45  ;;  %2819 = vtanh.f32 %v885_v43  ;;  %v809_v38 = vmul.f32 %v3313_v53, %v3519_v36  ;;  %v825_v27 = vmul.f32 %v3313_v53, %v3565_v29  ;;  %v498_v13 = vmul.f32 %v3316_v54, %v3505_v25 }
  0xbb   : > { %v2806_v30 = vpop.eup %2805  ;;  %2617 = vmatpush1.bf16.msra.mxu1 %v2616_v14  ;;  %2821 = vtanh.f32 %v882_v60  ;;  %v601_v37 = vadd.f32 %v3541_v12, %v517_v51  ;;  %v514_v52 = vmul.f32 %v3316_v54, %v3463_v41  ;;  %v806_v23 = vmul.f32 %v3320_v56, %v3519_v36 }
  0xbc   : > { %v2808_v3 = vpop.eup %2807  ;;  %2823 = vtanh.f32 %v884_v21  ;;  %v873_v7 = vadd.f32 %v809_v38, %v585_v17  ;;  %v582_v8 = vadd.f32 %v3525_v55, %v498_v13  ;;  %v822_v53 = vmul.f32 %v3320_v56, %v3565_v29  ;;  %v4092_v38 = vld [vmem:[#allocation10_spill] sm:$0xff] }
  0xbd   : > { %v3600_v9 = vpop.eup %2809  ;;  %2825 = vtanh.f32 %v838_v10  ;;  %v889_v39 = vadd.f32 %v825_v27, %v601_v37  ;;  %v598_v4 = vadd.f32 %v3541_v12, %v514_v52  ;;  %v500_v54 = vmul.f32 %v3323_v57, %v3505_v25  ;;  %v4093_v37 = vld [vmem:[#allocation8_spill] sm:$0xff] }
  0xbe   : > { %v2812_v40 = vpop.eup %2811  ;;  %2827 = vtanh.f32 %v3501_v19  ;;  %v870_v42 = vadd.f32 %v806_v23, %v582_v8  ;;  %v516_v31 = vmul.f32 %v3323_v57, %v3463_v41  ;;  %v808_v50 = vmul.f32 %v3326_v58, %v3519_v36 }
  0xbf   : > { %v2622_v56 = vpack.c.bf16 %v3581_v49, %v2812_v40  ;;  %2829 = vtanh.f32 %v840_v18  ;;  %v886_v10 = vadd.f32 %v822_v53, %v598_v4  ;;  %v584_v44 = vadd.f32 %v3525_v55, %v500_v54  ;;  %v4094_v53 = vld [vmem:[#allocation11_spill] sm:$0xff] }
  0xc0   : > { %v2814_v5 = vpop.eup %2813  ;;  %2831 = vtanh.f32 %v3503_v20  ;;  %v600_v16 = vadd.f32 %v3541_v12, %v516_v31  ;;  %v824_v19 = vmul.f32 %v3326_v58, %v3565_v29  ;;  %v471_v57 = vmul.f32 %v3329_v59, %v3393_v33 }
  0xc1   : > { %2833 = vtanh.f32 %v871_v61  ;;  %v872_v28 = vadd.f32 %v808_v50, %v584_v44  ;;  %v487_v18 = vmul.f32 %v3329_v59, %v3429_v2  ;;  %v779_v46 = vmul.f32 %v3365_v22, %v3497_v34 }
  0xc2   : > { %v2816_v35 = vpop.eup %2815  ;;  %2835 = vtanh.f32 %v887_v47  ;;  %v888_v48 = vadd.f32 %v824_v19, %v600_v16  ;;  %v555_v20 = vadd.f32 %v3391_v32, %v471_v57  ;;  %v795_v6 = vmul.f32 %v3365_v22, %v3469_v11 }
  0xc3   : > { %v2818_v58 = vpop.eup %2817  ;;  %v2630_v62 = vpack.c.bf16 %v2816_v35, %v2814_v5  ;;  %2837 = vtanh.f32 %v873_v7  ;;  %v571_v61 = vadd.f32 %v3427_v1, %v487_v18  ;;  %v473_v63 = vmul.f32 %v3356_v24, %v3393_v33  ;;  %v4096_v35 = vld [vmem:[#allocation13_spill] sm:$0xff] }
  0xc4   : > { %v2820_v0 = vpop.eup %2819  ;;  %v2610_v43 = vpack.c.bf16 %v2818_v58, %v2804_v26  ;;  %2839 = vtanh.f32 %v889_v39  ;;  %v843_v60 = vadd.f32 %v779_v46, %v555_v20  ;;  %v489_v15 = vmul.f32 %v3356_v24, %v3429_v2 }
  0xc5   : > { %v2822_v45 = vpop.eup %2821  ;;  %v2618_v21 = vpack.c.bf16 %v2820_v0, %v2806_v30  ;;  %2841 = vtanh.f32 %v870_v42  ;;  %v859_v47 = vadd.f32 %v795_v6, %v571_v61  ;;  %v557_v49 = vadd.f32 %v3391_v32, %v473_v63 }
  0xc6   : > { %v2824_v14 = vpop.eup %2823  ;;  %2611 = vmatprep.subr.bf16.mxu0 %v2610_v43  ;;  %v2612_v51 = vpack.c.bf16 %v2822_v45, %v2808_v3  ;;  %2843 = vtanh.f32 %v886_v10  ;;  %v573_v17 = vadd.f32 %v3427_v1, %v489_v15  ;;  %v781_v26 = vmul.f32 %v4092_v38, %v3497_v34  ;;  %v3642_v3 = vld [vmem:[%s4053_s3] sm:$0xff] }
  0xc7   : > { %v2826_v27 = vpop.eup %2825  ;;  %2619 = vmatprep.subr.bf16.mxu1 %v2618_v21  ;;  %v2620_v13 = vpack.c.bf16 %v2824_v14, %v3600_v9  ;;  %2845 = vtanh.f32 %v872_v28  ;;  %v797_v30 = vmul.f32 %v4092_v38, %v3469_v11  ;;  %v470_v52 = vmul.f32 %v4093_v37, %v3393_v33  ;;  %v4095_v10 = vld [vmem:[#allocation9_spill] sm:$0xff]  ;;  %v3663_v28 = vld [vmem:[%s4053_s3 + $0x8] sm:$0xff] }
  0xc8   : > { %v2828_v23 = vpop.eup %2827  ;;  %2613 = vmatpush1.bf16.msra.mxu0 %v2612_v51  ;;  %2847 = vtanh.f32 %v888_v48  ;;  %v845_v7 = vadd.f32 %v781_v26, %v557_v49  ;;  %v486_v8 = vmul.f32 %v4093_v37, %v3429_v2  ;;  %v778_v9 = vmul.f32 %v4094_v53, %v3497_v34 }
  0xc9   : > { %v2830_v39 = vpop.eup %2829  ;;  %2621 = vmatpush1.bf16.msra.mxu1 %v2620_v13  ;;  %2623 = vmatprep.subr.bf16.mxu0 %v2622_v56  ;;  %v2624_v4 = vpack.c.bf16 %v2828_v23, %v2826_v27  ;;  %2849 = vtanh.f32 %v843_v60  ;;  %v861_v54 = vadd.f32 %v797_v30, %v573_v17  ;;  %v554_v40 = vadd.f32 %v3391_v32, %v470_v52  ;;  %v3692_v27 = vld [vmem:[%s4053_s3 + $0x10] sm:$0xff] }
  0xca   : > { %v2832_v42 = vpop.eup %2831  ;;  %2631 = vmatprep.subr.bf16.mxu1 %v2630_v62  ;;  %2851 = vtanh.f32 %v859_v47  ;;  %v570_v31 = vadd.f32 %v3427_v1, %v486_v8  ;;  %v794_v50 = vmul.f32 %v4094_v53, %v3469_v11  ;;  %v472_v44 = vmul.f32 %v4095_v10, %v3393_v33 }
  0xcb   : > { %v2834_v5 = vpop.eup %2833  ;;  %2560 = vmatmul.mubr.msk.f32.vlgmr.msra.gmra.mrb[0].mxu0 %vm990_vm0, %v3642_v3  ;;  %v2632_v56 = vpack.c.bf16 %v2832_v42, %v2830_v39  ;;  %2853 = vtanh.f32 %v845_v7  ;;  %v842_v16 = vadd.f32 %v778_v9, %v554_v40  ;;  %v488_v19 = vmul.f32 %v4095_v10, %v3429_v2 }
  0xcc   : > { %v2836_v57 = vpop.eup %2835  ;;  %2564 = vmatmul.mubr.msk.f32.vlgmr.msra.gmra.mrb[0].mxu1 %vm990_vm0, %v3642_v3  ;;  %2625 = vmatpush1.bf16.msra.mxu0 %v2624_v4  ;;  %2855 = vtanh.f32 %v861_v54  ;;  %v858_v18 = vadd.f32 %v794_v50, %v570_v31  ;;  %v556_v46 = vadd.f32 %v3391_v32, %v472_v44  ;;  %v780_v48 = vmul.f32 %v4096_v35, %v3497_v34 }
  0xcd   : > { %v2838_v20 = vpop.eup %2837  ;;  %2633 = vmatpush1.bf16.msra.mxu1 %v2632_v56  ;;  %v2626_v6 = vpack.c.bf16 %v2836_v57, %v2834_v5  ;;  %v4097_v58 = vmov 0.0   ;;  %2857 = vtanh.f32 %v842_v16  ;;  %v572_v62 = vadd.f32 %v3427_v1, %v488_v19  ;;  %v3720_v5 = vld [vmem:[%s4053_s3 + $0x18] sm:$0xff] }
  0xce   : > { %1073 = vmatprep.mubr.f32.mxu0 %v4097_v58  ;;  %v796_v61 = vmul.f32 %v4096_v35, %v3469_v11  ;;  %v2840_v63 = vpop.eup %2839  ;;  %1162 = vmatprep.mubr.f32.mxu1 %v4097_v58  ;;  %2859 = vtanh.f32 %v858_v18  ;;  %v844_v0 = vadd.f32 %v780_v48, %v556_v46  ;;  %v503_v43 = vmul.f32 %v3329_v59, %v3505_v25 }
  0xcf   : > { %v519_v60 = vmul.f32 %v3329_v59, %v3463_v41  ;;  %v2842_v15 = vpop.eup %2841  ;;  %2627 = vmatprep.subr.bf16.mxu0 %v2626_v6  ;;  %v2634_v45 = vpack.c.bf16 %v2840_v63, %v2838_v20  ;;  %2561 = vmatmul.mubr.msk.f32.gmra.mrb[2].mxu0 %vm990_vm0, %v3663_v28  ;;  %v811_v47 = vmul.f32 %v3365_v22, %v3519_v36 }
  0xd0   : > { %v860_v21 = vadd.f32 %v796_v61, %v572_v62  ;;  %v2844_v49 = vpop.eup %2843  ;;  %2565 = vmatmul.mubr.msk.f32.gmra.mrb[2].mxu1 %vm990_vm0, %v3663_v28  ;;  %1079 = vmatprep.mubr.f32.mxu0 %v4097_v58  ;;  %2861 = vtanh.f32 %v844_v0  ;;  %v587_v14 = vadd.f32 %v3525_v55, %v503_v43  ;;  %v827_v51 = vmul.f32 %v3365_v22, %v3565_v29 }
  0xd1   : > { %v603_v59 = vadd.f32 %v3541_v12, %v519_v60  ;;  %v2846_v17 = vpop.eup %2845  ;;  %2635 = vmatprep.subr.bf16.mxu1 %v2634_v45  ;;  %v2628_v26 = vpack.c.bf16 %v2844_v49, %v2842_v15  ;;  %1168 = vmatprep.mubr.f32.mxu1 %v4097_v58  ;;  %v505_v13 = vmul.f32 %v3356_v24, %v3505_v25 }
  0xd2   : > { %2863 = vtanh.f32 %v860_v21  ;;  %v521_v30 = vmul.f32 %v3356_v24, %v3463_v41  ;;  %v2848_v52 = vpop.eup %2847  ;;  %v875_v23 = vadd.f32 %v811_v47, %v587_v14  ;;  %v813_v7 = vmul.f32 %v4092_v38, %v3519_v36  ;;  %v4099_v47 = vld [vmem:[#allocation17_spill] sm:$0xff] }
  0xd3   : > { %v891_v22 = vadd.f32 %v827_v51, %v603_v59  ;;  %v829_v8 = vmul.f32 %v4092_v38, %v3565_v29  ;;  %v2850_v9 = vpop.eup %2849  ;;  %2629 = vmatpush1.bf16.msra.mxu0 %v2628_v26  ;;  %v2636_v39 = vpack.c.bf16 %v2848_v52, %v2846_v17  ;;  %v589_v4 = vadd.f32 %v3525_v55, %v505_v13 }
  0xd4   : > { %v605_v54 = vadd.f32 %v3541_v12, %v521_v30  ;;  %v502_v40 = vmul.f32 %v4093_v37, %v3505_v25  ;;  %v2852_v24 = vpop.eup %2851  ;;  %2562 = vmatmul.mubr.msk.f32.gmra.mrb[4].mxu0 %vm990_vm0, %v3692_v27  ;;  %2566 = vmatmul.mubr.msk.f32.gmra.mrb[4].mxu1 %vm990_vm0, %v3692_v27  ;;  %2865 = vtanh.f32 %v875_v23  ;;  %v518_v38 = vmul.f32 %v4093_v37, %v3463_v41  ;;  %v4100_v30 = vld [vmem:[#allocation14_spill] sm:$0xff] }
  0xd5   : > { %v810_v42 = vmul.f32 %v4094_v53, %v3519_v36  ;;  %v826_v31 = vmul.f32 %v4094_v53, %v3565_v29  ;;  %v2854_v50 = vpop.eup %2853  ;;  %2637 = vmatpush1.bf16.msra.mxu1 %v2636_v39  ;;  %v2638_v44 = vpack.c.bf16 %v2852_v24, %v2850_v9  ;;  %1085 = vmatprep.mubr.f32.mxu0 %v4097_v58  ;;  %2867 = vtanh.f32 %v891_v22 }
  0xd6   : > { %v877_v56 = vadd.f32 %v813_v7, %v589_v4  ;;  %v893_v16 = vadd.f32 %v829_v8, %v605_v54  ;;  %v2856_v37 = vpop.eup %2855  ;;  %1174 = vmatprep.mubr.f32.mxu1 %v4097_v58  ;;  %v586_v19 = vadd.f32 %v3525_v55, %v502_v40  ;;  %v602_v53 = vadd.f32 %v3541_v12, %v518_v38  ;;  %v4101_v7 = vld [vmem:[#allocation18_spill] sm:$0xff]  ;;  %v4102_v38 = vld [vmem:[#allocation15_spill] sm:$0xff] }
  0xd7   : > { %v504_v57 = vmul.f32 %v4095_v10, %v3505_v25  ;;  %v520_v18 = vmul.f32 %v4095_v10, %v3463_v41  ;;  %v2858_v46 = vpop.eup %2857  ;;  %2639 = vmatprep.subr.bf16.mxu0 %v2638_v44  ;;  %v2646_v48 = vpack.c.bf16 %v2856_v37, %v2854_v50  ;;  %v812_v20 = vmul.f32 %v4096_v35, %v3519_v36 }
  0xd8   : > { %2869 = vtanh.f32 %v877_v56  ;;  %v828_v6 = vmul.f32 %v4096_v35, %v3565_v29  ;;  %v2860_v62 = vpop.eup %2859  ;;  %2563 = vmatmul.mubr.msk.f32.gmra.mrb[6].mxu0 %vm990_vm0, %v3720_v5  ;;  %2567 = vmatmul.mubr.msk.f32.gmra.mrb[6].mxu1 %vm990_vm0, %v3720_v5  ;;  %v874_v61 = vadd.f32 %v810_v42, %v586_v19  ;;  %v890_v10 = vadd.f32 %v826_v31, %v602_v53  ;;  %v4098_v35 = vld [vmem:[#allocation12_spill] sm:$0xff]  ;;  %v4103_v56 = vld [vmem:[#allocation19_spill] sm:$0xff] }
  0xd9   : > { %2871 = vtanh.f32 %v893_v16  ;;  %v588_v63 = vadd.f32 %v3525_v55, %v504_v57  ;;  %2647 = vmatprep.subr.bf16.mxu1 %v2646_v48  ;;  %1245 = vmatprep.mubr.f32.mxu0 %v4097_v58  ;;  %v2640_v0 = vpack.c.bf16 %v2860_v62, %v2858_v46  ;;  %v604_v43 = vadd.f32 %v3541_v12, %v520_v18  ;;  %v4104_v48 = vld [vmem:[#allocation16_spill] sm:$0xff] }
  0xda   : > { %v475_v60 = vmul.f32 %v4098_v35, %v3393_v33  ;;  %v2862_v15 = vpop.eup %2861  ;;  %1334 = vmatprep.mubr.f32.mxu1 %v4097_v58  ;;  %2873 = vtanh.f32 %v874_v61  ;;  %v491_v21 = vmul.f32 %v4098_v35, %v3429_v2  ;;  %v783_v49 = vmul.f32 %v4099_v47, %v3497_v34 }
  0xdb   : > { %v876_v45 = vadd.f32 %v812_v20, %v588_v63  ;;  %2875 = vtanh.f32 %v890_v10  ;;  %v892_v59 = vadd.f32 %v828_v6, %v604_v43  ;;  %v799_v17 = vmul.f32 %v4099_v47, %v3469_v11  ;;  %v4105_v10 = vld [vmem:[#allocation20_spill] sm:$0xff] }
  0xdc   : > { %v2864_v14 = vpop.eup %2863  ;;  %v559_v51 = vadd.f32 %v3391_v32, %v475_v60  ;;  %2568 = vmatmul.mubr.msk.f32.vlgmr.msra.gmra.mrb[8].mxu0 %vm990_vm0, %v3642_v3  ;;  %2572 = vmatmul.mubr.msk.f32.vlgmr.msra.gmra.mrb[8].mxu1 %vm990_vm0, %v3642_v3  ;;  %v575_v13 = vadd.f32 %v3427_v1, %v491_v21  ;;  %v477_v52 = vmul.f32 %v4100_v30, %v3393_v33 }
  0xdd   : > { %v2648_v26 = vpack.c.bf16 %v2864_v14, %v2862_v15  ;;  %2877 = vtanh.f32 %v876_v45  ;;  %2641 = vmatpush1.bf16.msra.mxu0 %v2640_v0  ;;  %1251 = vmatprep.mubr.f32.mxu0 %v4097_v58  ;;  %v493_v22 = vmul.f32 %v4100_v30, %v3429_v2  ;;  %v785_v8 = vmul.f32 %v4101_v7, %v3497_v34 }
  0xde   : > { %2879 = vtanh.f32 %v892_v59  ;;  %v847_v23 = vadd.f32 %v783_v49, %v559_v51  ;;  %v2866_v9 = vpop.eup %2865  ;;  %1340 = vmatprep.mubr.f32.mxu1 %v4097_v58  ;;  %v863_v39 = vadd.f32 %v799_v17, %v575_v13  ;;  %v561_v4 = vadd.f32 %v3391_v32, %v477_v52 }
  0xdf   : > { %2649 = vmatpush1.bf16.msra.mxu1 %v2648_v26  ;;  %v801_v54 = vmul.f32 %v4101_v7, %v3469_v11  ;;  %v2868_v40 = vpop.eup %2867  ;;  %v577_v24 = vadd.f32 %v3427_v1, %v493_v22  ;;  %v474_v42 = vmul.f32 %v4102_v38, %v3393_v33  ;;  %v490_v31 = vmul.f32 %v4102_v38, %v3429_v2 }
  0xe0   : > { %2881 = vtanh.f32 %v847_v23  ;;  %v2642_v50 = vpack.c.bf16 %v2868_v40, %v2866_v9  ;;  %2569 = vmatmul.mubr.msk.f32.gmra.mrb[10].mxu0 %vm990_vm0, %v3663_v28  ;;  %2573 = vmatmul.mubr.msk.f32.gmra.mrb[10].mxu1 %vm990_vm0, %v3663_v28  ;;  %v849_v44 = vadd.f32 %v785_v8, %v561_v4  ;;  %v782_v16 = vmul.f32 %v4103_v56, %v3497_v34 }
  0xe1   : > { %2883 = vtanh.f32 %v863_v39  ;;  %v865_v19 = vadd.f32 %v801_v54, %v577_v24  ;;  %1257 = vmatprep.mubr.f32.mxu0 %v4097_v58  ;;  %1346 = vmatprep.mubr.f32.mxu1 %v4097_v58  ;;  %v558_v53 = vadd.f32 %v3391_v32, %v474_v42  ;;  %v574_v57 = vadd.f32 %v3427_v1, %v490_v31 }
  0xe2   : > { %v2870_v37 = vpop.eup %2869  ;;  %2643 = vmatprep.subr.bf16.mxu0 %v2642_v50  ;;  %2885 = vtanh.f32 %v849_v44  ;;  %v798_v46 = vmul.f32 %v4103_v56, %v3469_v11  ;;  %v476_v20 = vmul.f32 %v4104_v48, %v3393_v33  ;;  %v492_v6 = vmul.f32 %v4104_v48, %v3429_v2 }
  0xe3   : > { %v2872_v18 = vpop.eup %2871  ;;  %2887 = vtanh.f32 %v865_v19  ;;  %v846_v61 = vadd.f32 %v782_v16, %v558_v53  ;;  %v784_v63 = vmul.f32 %v4105_v10, %v3497_v34  ;;  %v800_v34 = vmul.f32 %v4105_v10, %v3469_v11 }
  0xe4   : > { %v2650_v62 = vpack.c.bf16 %v2872_v18, %v2870_v37  ;;  %v2874_v0 = vpop.eup %2873  ;;  %2570 = vmatmul.mubr.msk.f32.gmra.mrb[12].mxu0 %vm990_vm0, %v3692_v27  ;;  %2574 = vmatmul.mubr.msk.f32.gmra.mrb[12].mxu1 %vm990_vm0, %v3692_v27  ;;  %v862_v43 = vadd.f32 %v798_v46, %v574_v57  ;;  %v560_v60 = vadd.f32 %v3391_v32, %v476_v20 }
  0xe5   : > { %v576_v33 = vadd.f32 %v3427_v1, %v492_v6  ;;  %v2876_v15 = vpop.eup %2875  ;;  %1263 = vmatprep.mubr.f32.mxu0 %v4097_v58  ;;  %2889 = vtanh.f32 %v846_v61  ;;  %v507_v2 = vmul.f32 %v4098_v35, %v3505_v25  ;;  %v523_v45 = vmul.f32 %v4098_v35, %v3463_v41  ;;  %1352 = vmatprep.mubr.f32.mxu1 %v4097_v58 }
  0xe6   : > { %2651 = vmatprep.subr.bf16.mxu1 %v2650_v62  ;;  %v2644_v49 = vpack.c.bf16 %v2876_v15, %v2874_v0  ;;  %2891 = vtanh.f32 %v862_v43  ;;  %v848_v32 = vadd.f32 %v784_v63, %v560_v60  ;;  %v815_v1 = vmul.f32 %v4099_v47, %v3519_v36 }
  0xe7   : > { %v2878_v21 = vpop.eup %2877  ;;  %v864_v59 = vadd.f32 %v800_v34, %v576_v33  ;;  %v591_v51 = vadd.f32 %v3525_v55, %v507_v2  ;;  %v607_v11 = vadd.f32 %v3541_v12, %v523_v45  ;;  %v831_v17 = vmul.f32 %v4099_v47, %v3565_v29 }
  0xe8   : > { %v2880_v14 = vpop.eup %2879  ;;  %2645 = vmatpush1.bf16.msra.mxu0 %v2644_v49  ;;  %2575 = vmatmul.mubr.msk.f32.gmra.mrb[14].mxu1 %vm990_vm0, %v3720_v5  ;;  %2893 = vtanh.f32 %v848_v32  ;;  %v509_v26 = vmul.f32 %v4100_v30, %v3505_v25  ;;  %v525_v13 = vmul.f32 %v4100_v30, %v3463_v41  ;;  %v817_v22 = vmul.f32 %v4101_v7, %v3519_v36 }
  0xe9   : > { %v2652_v35 = vpack.c.bf16 %v2880_v14, %v2878_v21  ;;  %2571 = vmatmul.mubr.msk.f32.gmra.mrb[14].mxu0 %vm990_vm0, %v3720_v5  ;;  %1512 = vmatprep.mubr.f32.mxu1 %v4097_v58  ;;  %2895 = vtanh.f32 %v864_v59  ;;  %v879_v47 = vadd.f32 %v815_v1, %v591_v51  ;;  %v895_v23 = vadd.f32 %v831_v17, %v607_v11  ;;  %v3897_v59 = vpop.permute.xlu0 %977 }
  0xea   : > { %v2882_v52 = vpop.eup %2881  ;;  %1423 = vmatprep.mubr.f32.mxu0 %v4097_v58  ;;  %v593_v9 = vadd.f32 %v3525_v55, %v509_v26  ;;  %v609_v30 = vadd.f32 %v3541_v12, %v525_v13  ;;  %v833_v39 = vmul.f32 %v4101_v7, %v3565_v29  ;;  %v506_v54 = vmul.f32 %v4102_v38, %v3505_v25 }
  0xeb   : > { %v2884_v8 = vpop.eup %2883  ;;  %2653 = vmatpush1.bf16.msra.mxu1 %v2652_v35  ;;  %2897 = vtanh.f32 %v879_v47  ;;  %v522_v40 = vmul.f32 %v4102_v38, %v3463_v41  ;;  %v814_v50 = vmul.f32 %v4103_v56, %v3519_v36  ;;  %v830_v37 = vmul.f32 %v4103_v56, %v3565_v29 }
  0xec   : > { %v2654_v4 = vpack.c.bf16 %v2884_v8, %v2882_v52  ;;  %v2886_v24 = vpop.eup %2885  ;;  %2899 = vtanh.f32 %v895_v23  ;;  %v881_v42 = vadd.f32 %v817_v22, %v593_v9  ;;  %v897_v31 = vadd.f32 %v833_v39, %v609_v30 }
  0xed   : > { %v2888_v44 = vpop.eup %2887  ;;  %2576 = vmatmul.mubr.msk.f32.vlgmr.msra.gmra.mrb[16].mxu0 %vm990_vm0, %v3642_v3  ;;  %v590_v7 = vadd.f32 %v3525_v55, %v506_v54  ;;  %v606_v16 = vadd.f32 %v3541_v12, %v522_v40  ;;  %v508_v19 = vmul.f32 %v4104_v48, %v3505_v25  ;;  %v524_v53 = vmul.f32 %v4104_v48, %v3463_v41 }
  0xee   : > { %2655 = vmatprep.subr.bf16.mxu0 %v2654_v4  ;;  %v2662_v38 = vpack.c.bf16 %v2888_v44, %v2886_v24  ;;  %2580 = vmatmul.mubr.msk.f32.vlgmr.msra.gmra.mrb[16].mxu1 %vm990_vm0, %v3642_v3  ;;  %2901 = vtanh.f32 %v881_v42  ;;  %v816_v56 = vmul.f32 %v4105_v10, %v3519_v36  ;;  %v832_v25 = vmul.f32 %v4105_v10, %v3565_v29 }
  0xef   : > { %1429 = vmatprep.mubr.f32.mxu0 %v4097_v58  ;;  %v2890_v57 = vpop.eup %2889  ;;  %2903 = vtanh.f32 %v897_v31  ;;  %1518 = vmatprep.mubr.f32.mxu1 %v4097_v58  ;;  %v878_v18 = vadd.f32 %v814_v50, %v590_v7  ;;  %v894_v46 = vadd.f32 %v830_v37, %v606_v16  ;;  %v592_v6 = vadd.f32 %v3525_v55, %v508_v19 }
  0xf0   : > { %v2892_v20 = vpop.eup %2891  ;;  %2663 = vmatprep.subr.bf16.mxu1 %v2662_v38  ;;  %v608_v62 = vadd.f32 %v3541_v12, %v524_v53 }
  0xf1   : > { %v2656_v61 = vpack.c.bf16 %v2892_v20, %v2890_v57  ;;  %2577 = vmatmul.mubr.msk.f32.gmra.mrb[18].mxu0 %vm990_vm0, %v3663_v28  ;;  %2905 = vtanh.f32 %v878_v18  ;;  %v880_v36 = vadd.f32 %v816_v56, %v592_v6 }
  0xf2   : > { %v2894_v41 = vpop.eup %2893  ;;  %2581 = vmatmul.mubr.msk.f32.gmra.mrb[18].mxu1 %vm990_vm0, %v3663_v28  ;;  %2907 = vtanh.f32 %v894_v46  ;;  %v896_v48 = vadd.f32 %v832_v25, %v608_v62  ;;  %1435 = vmatprep.mubr.f32.mxu0 %v4097_v58 }
  0xf3   : > { %v2896_v55 = vpop.eup %2895  ;;  %2657 = vmatpush1.bf16.msra.mxu0 %v2656_v61  ;;  %1524 = vmatprep.mubr.f32.mxu1 %v4097_v58  ;;  %2909 = vtanh.f32 %v880_v36 }
  0xf4   : > { %v2664_v12 = vpack.c.bf16 %v2896_v55, %v2894_v41  ;;  %2911 = vtanh.f32 %v896_v48 }
  0xf5   : > { %v2898_v29 = vpop.eup %2897  ;;  %2578 = vmatmul.mubr.msk.f32.gmra.mrb[20].mxu0 %vm990_vm0, %v3692_v27 }
  0xf6   : > { %v2900_v10 = vpop.eup %2899  ;;  %2665 = vmatpush1.bf16.msra.mxu1 %v2664_v12  ;;  %1441 = vmatprep.mubr.f32.mxu0 %v4097_v58 }
  0xf7   : > { %v2658_v63 = vpack.c.bf16 %v2900_v10, %v2898_v29  ;;  %2582 = vmatmul.mubr.msk.f32.gmra.mrb[20].mxu1 %vm990_vm0, %v3692_v27 }
  0xf8   : > { %v2902_v0 = vpop.eup %2901  ;;  %1530 = vmatprep.mubr.f32.mxu1 %v4097_v58 }
  0xf9   : > { %v2904_v43 = vpop.eup %2903  ;;  %2659 = vmatprep.subr.bf16.mxu0 %v2658_v63  ;;  %2579 = vmatmul.mubr.msk.f32.gmra.mrb[22].mxu0 %vm990_vm0, %v3720_v5 }
  0xfa   : > { %v2666_v60 = vpack.c.bf16 %v2904_v43, %v2902_v0  ;;  %1601 = vmatprep.mubr.f32.mxu0 %v4097_v58 }
  0xfb   : > { %v2906_v33 = vpop.eup %2905  ;;  %2583 = vmatmul.mubr.msk.f32.gmra.mrb[22].mxu1 %vm990_vm0, %v3720_v5 }
  0xfc   : > { %v2908_v15 = vpop.eup %2907  ;;  %2667 = vmatprep.subr.bf16.mxu1 %v2666_v60  ;;  %1690 = vmatprep.mubr.f32.mxu1 %v4097_v58 }
  0xfd   : > { %v2660_v34 = vpack.c.bf16 %v2908_v15, %v2906_v33  ;;  %v2910_v2 = vpop.eup %2909 }
  0xfe   : > { %v2912_v45 = vpop.eup %2911 }
  0xff   : > { %2661 = vmatpush1.bf16.msra.mxu0 %v2660_v34  ;;  %v2668_v21 = vpack.c.bf16 %v2912_v45, %v2910_v2 }
 0x101   : > { %2669 = vmatpush1.bf16.msra.mxu1 %v2668_v21 }
 0x102   : > { %2584 = vmatmul.mubr.msk.f32.vlgmr.msra.gmra.mrb[24].mxu0 %vm990_vm0, %v3642_v3 }
 0x103   : > { %1607 = vmatprep.mubr.f32.mxu0 %v4097_v58 }
 0x104   : > { %2588 = vmatmul.mubr.msk.f32.vlgmr.msra.gmra.mrb[24].mxu1 %vm990_vm0, %v3642_v3  ;;  %v3893_v3 = vpop.permute.xlu1 %972 }
 0x105   : > { %1696 = vmatprep.mubr.f32.mxu1 %v4097_v58 }
 0x106   : > { %2585 = vmatmul.mubr.msk.f32.gmra.mrb[26].mxu0 %vm990_vm0, %v3663_v28 }
 0x107   : > { %1613 = vmatprep.mubr.f32.mxu0 %v4097_v58 }
 0x108   : > { %2589 = vmatmul.mubr.msk.f32.gmra.mrb[26].mxu1 %vm990_vm0, %v3663_v28  ;;  %v3901_v17 = vpop.permute.xlu1 %982 }
 0x109   : > { %1702 = vmatprep.mubr.f32.mxu1 %v4097_v58 }
 0x10a   : > { %2586 = vmatmul.mubr.msk.f32.gmra.mrb[28].mxu0 %vm990_vm0, %v3692_v27 }
 0x10b   : > { %1619 = vmatprep.mubr.f32.mxu0 %v4097_v58 }
 0x10c   : > { %2590 = vmatmul.mubr.msk.f32.gmra.mrb[28].mxu1 %vm990_vm0, %v3692_v27  ;;  %v3911_v42 = vpop.permute.xlu1 %987 }
 0x10d   : > { %1708 = vmatprep.mubr.f32.mxu1 %v4097_v58 }
 0x10e   : > { %2587 = vmatmul.mubr.msk.f32.gmra.mrb[30].mxu0 %vm990_vm0, %v3720_v5 }
 0x10f   : > { %1857 = vmatprep.mubr.f32.mxu0 %v4097_v58 }
 0x110   : > { %2591 = vmatmul.mubr.msk.f32.gmra.mrb[30].mxu1 %vm990_vm0, %v3720_v5 }
 0x111   : > { %1928 = vmatprep.mubr.f32.mxu1 %v4097_v58 }
 0x19e   : > { %v1069_v28 = vpop.f32.mrb[0].mxu0 }
 0x19f   : > { %v1158_v49 = vpop.f32.mrb[0].mxu1  ;;  %v1071_v32 = vpop.f32.mrb[1].mxu0  ;;  %v1070_v1 = vadd.f32 %v1069_v28, %v3893_v3 }
 0x1a0   : > { %v1072_v27 = vadd.f32 %v1071_v32, %v3893_v3  ;;  %v1160_v14 = vpop.f32.mrb[1].mxu1  ;;  %v1159_v51 = vadd.f32 %v1158_v49, %v3893_v3 }
 0x1a1   : > { %v1161_v11 = vadd.f32 %v1160_v14, %v3893_v3  ;;  %2913 = vtanh.f32 %v1070_v1 }
 0x1a2   : > { %2915 = vtanh.f32 %v1072_v27  ;;  %v1075_v5 = vpop.f32.mrb[2].mxu0 }
 0x1a3   : > { %2917 = vtanh.f32 %v1161_v11  ;;  %v1076_v35 = vadd.f32 %v1075_v5, %v3897_v59  ;;  %v1164_v26 = vpop.f32.mrb[2].mxu1  ;;  %v1077_v13 = vpop.f32.mrb[3].mxu0 }
 0x1a4   : > { %v1165_v52 = vadd.f32 %v1164_v26, %v3897_v59  ;;  %v1078_v47 = vadd.f32 %v1077_v13, %v3897_v59  ;;  %v1166_v23 = vpop.f32.mrb[3].mxu1  ;;  %2919 = vtanh.f32 %v1159_v51 }
 0x1a5   : > { %2921 = vtanh.f32 %v1076_v35  ;;  %v1167_v22 = vadd.f32 %v1166_v23, %v3897_v59 }
 0x1a6   : > { %2923 = vtanh.f32 %v1165_v52 }
 0x1a7   : > { %2925 = vtanh.f32 %v1078_v47  ;;  %v1081_v8 = vpop.f32.mrb[4].mxu0  ;;  %v1170_v9 = vpop.f32.mrb[4].mxu1 }
 0x1a8   : > { %2927 = vtanh.f32 %v1167_v22  ;;  %v1082_v30 = vadd.f32 %v1081_v8, %v3901_v17  ;;  %v1171_v39 = vadd.f32 %v1170_v9, %v3901_v17  ;;  %v1083_v4 = vpop.f32.mrb[5].mxu0  ;;  %v1172_v54 = vpop.f32.mrb[5].mxu1 }
 0x1a9   : > { %v1084_v40 = vadd.f32 %v1083_v4, %v3901_v17  ;;  %v1173_v24 = vadd.f32 %v1172_v54, %v3901_v17 }
 0x1aa   : > { %2929 = vtanh.f32 %v1082_v30 }
 0x1ab   : > { %v2914_v31 = vpop.eup %2913  ;;  %2931 = vtanh.f32 %v1171_v39  ;;  %v1087_v50 = vpop.f32.mrb[6].mxu0 }
 0x1ac   : > { %v1176_v44 = vpop.f32.mrb[6].mxu1  ;;  %v2916_v7 = vpop.eup %2915  ;;  %2933 = vtanh.f32 %v1084_v40  ;;  %v1088_v16 = vadd.f32 %v1087_v50, %v3911_v42 }
 0x1ad   : > { %v1177_v37 = vadd.f32 %v1176_v44, %v3911_v42  ;;  %v1089_v38 = vpop.f32.mrb[7].mxu0  ;;  %v1178_v19 = vpop.f32.mrb[7].mxu1  ;;  %2935 = vtanh.f32 %v1173_v24 }
 0x1ae   : > { %v2918_v53 = vpop.eup %2917  ;;  %v1090_v57 = vadd.f32 %v1089_v38, %v3911_v42  ;;  %v1179_v18 = vadd.f32 %v1178_v19, %v3911_v42  ;;  %2937 = vtanh.f32 %v1088_v16 }
 0x1af   : > { %v2920_v46 = vpop.eup %2919  ;;  %2939 = vtanh.f32 %v1177_v37  ;;  %v1247_v20 = vpop.f32.mrb[8].mxu0 }
 0x1b0   : > { %v2922_v56 = vpop.eup %2921  ;;  %v1336_v6 = vpop.f32.mrb[8].mxu1  ;;  %2941 = vtanh.f32 %v1090_v57  ;;  %v1248_v25 = vadd.f32 %v1247_v20, %v3893_v3 }
 0x1b1   : > { %v2924_v62 = vpop.eup %2923  ;;  %v1337_v61 = vadd.f32 %v1336_v6, %v3893_v3  ;;  %v1249_v41 = vpop.f32.mrb[9].mxu0  ;;  %v2672_v48 = vpack.c.bf16 %v2922_v56, %v2914_v31  ;;  %2943 = vtanh.f32 %v1179_v18 }
 0x1b2   : > { %v1338_v36 = vpop.f32.mrb[9].mxu1  ;;  %v2926_v55 = vpop.eup %2925  ;;  %v1250_v12 = vadd.f32 %v1249_v41, %v3893_v3  ;;  %v2680_v10 = vpack.c.bf16 %v2924_v62, %v2920_v46  ;;  %2945 = vtanh.f32 %v1248_v25 }
 0x1b3   : > { %v1339_v29 = vadd.f32 %v1338_v36, %v3893_v3  ;;  %v2928_v63 = vpop.eup %2927  ;;  %v2670_v0 = vpack.c.bf16 %v2926_v55, %v2916_v7  ;;  %2947 = vtanh.f32 %v1337_v61  ;;  %v1253_v43 = vpop.f32.mrb[10].mxu0 }
 0x1b4   : > { %v1342_v60 = vpop.f32.mrb[10].mxu1  ;;  %v2678_v33 = vpack.c.bf16 %v2928_v63, %v2918_v53  ;;  %v2930_v15 = vpop.eup %2929  ;;  %2949 = vtanh.f32 %v1250_v12  ;;  %v1254_v34 = vadd.f32 %v1253_v43, %v3897_v59  ;;  %v3936_v53 = vld [vmem:[%s4055_s5] sm:$0x1] }
 0x1b5   : > { %v1343_v2 = vadd.f32 %v1342_v60, %v3897_v59  ;;  %v1255_v45 = vpop.f32.mrb[11].mxu0  ;;  %v1344_v21 = vpop.f32.mrb[11].mxu1  ;;  %2671 = vmatprep.subr.bf16.mxu0 %v2670_v0  ;;  %2951 = vtanh.f32 %v1339_v29 }
 0x1b6   : > { %v2932_v28 = vpop.eup %2931  ;;  %v1256_v49 = vadd.f32 %v1255_v45, %v3897_v59  ;;  %v1345_v32 = vadd.f32 %v1344_v21, %v3897_v59  ;;  %2679 = vmatprep.subr.bf16.mxu1 %v2678_v33  ;;  %2673 = vmatpush1.bf16.msra.mxu0 %v2672_v48  ;;  %2953 = vtanh.f32 %v1254_v34 }
 0x1b7   : > { %v2934_v1 = vpop.eup %2933  ;;  %2681 = vmatpush1.bf16.msra.mxu1 %v2680_v10  ;;  %2955 = vtanh.f32 %v1343_v2  ;;  %v1259_v14 = vpop.f32.mrb[12].mxu0 }
 0x1b8   : > { %v2936_v27 = vpop.eup %2935  ;;  %v1348_v51 = vpop.f32.mrb[12].mxu1  ;;  %2957 = vtanh.f32 %v1256_v49  ;;  %v1260_v5 = vadd.f32 %v1259_v14, %v3901_v17 }
 0x1b9   : > { %v2938_v11 = vpop.eup %2937  ;;  %v1349_v35 = vadd.f32 %v1348_v51, %v3901_v17  ;;  %v1261_v26 = vpop.f32.mrb[13].mxu0  ;;  %2959 = vtanh.f32 %v1345_v32 }
 0x1ba   : > { %v1350_v13 = vpop.f32.mrb[13].mxu1  ;;  %v2940_v52 = vpop.eup %2939  ;;  %v1262_v47 = vadd.f32 %v1261_v26, %v3901_v17  ;;  %v2676_v22 = vpack.c.bf16 %v2938_v11, %v2930_v15  ;;  %2961 = vtanh.f32 %v1260_v5 }
 0x1bb   : > { %v1351_v23 = vadd.f32 %v1350_v13, %v3901_v17  ;;  %v2942_v8 = vpop.eup %2941  ;;  %v2684_v9 = vpack.c.bf16 %v2940_v52, %v2932_v28  ;;  %2963 = vtanh.f32 %v1349_v35  ;;  %v1354_v39 = vpop.f32.mrb[14].mxu1 }
 0x1bc   : > { %v2944_v30 = vpop.eup %2943  ;;  %v2674_v4 = vpack.c.bf16 %v2942_v8, %v2934_v1  ;;  %2965 = vtanh.f32 %v1262_v47  ;;  %v1265_v40 = vpop.f32.mrb[14].mxu0  ;;  %v1355_v24 = vadd.f32 %v1354_v39, %v3911_v42 }
 0x1bd   : > { %v2946_v54 = vpop.eup %2945  ;;  %v1356_v31 = vpop.f32.mrb[15].mxu1  ;;  %v2682_v50 = vpack.c.bf16 %v2944_v30, %v2936_v27  ;;  %2967 = vtanh.f32 %v1351_v23  ;;  %v1266_v7 = vadd.f32 %v1265_v40, %v3911_v42 }
 0x1be   : > { %v2948_v44 = vpop.eup %2947  ;;  %v1267_v16 = vpop.f32.mrb[15].mxu0  ;;  %v1357_v37 = vadd.f32 %v1356_v31, %v3911_v42  ;;  %2675 = vmatprep.subr.bf16.mxu0 %v2674_v4  ;;  %2969 = vtanh.f32 %v1355_v24 }
 0x1bf   : > { %v2950_v38 = vpop.eup %2949  ;;  %v1268_v19 = vadd.f32 %v1267_v16, %v3911_v42  ;;  %2683 = vmatprep.subr.bf16.mxu1 %v2682_v50  ;;  %2677 = vmatpush1.bf16.msra.mxu0 %v2676_v22  ;;  %2971 = vtanh.f32 %v1266_v7 }
 0x1c0   : > { %v2952_v57 = vpop.eup %2951  ;;  %2685 = vmatpush1.bf16.msra.mxu1 %v2684_v9  ;;  %v1425_v46 = vpop.f32.mrb[16].mxu0 }
 0x1c1   : > { %v2954_v18 = vpop.eup %2953  ;;  %2973 = vtanh.f32 %v1268_v19  ;;  %v1426_v20 = vadd.f32 %v1425_v46, %v3893_v3  ;;  %v1514_v6 = vpop.f32.mrb[16].mxu1 }
 0x1c2   : > { %v2956_v56 = vpop.eup %2955  ;;  %2975 = vtanh.f32 %v1357_v37  ;;  %v1427_v62 = vpop.f32.mrb[17].mxu0  ;;  %2592 = vmatmul.mubr.msk.f32.vlgmr.msra.gmra.mrb[32].mxu0 %vm990_vm0, %v3936_v53  ;;  %v2688_v25 = vpack.c.bf16 %v2954_v18, %v2946_v54  ;;  %v1515_v41 = vadd.f32 %v1514_v6, %v3893_v3 }
 0x1c3   : > { %v2958_v61 = vpop.eup %2957  ;;  %v1428_v36 = vadd.f32 %v1427_v62, %v3893_v3  ;;  %v1516_v48 = vpop.f32.mrb[17].mxu1  ;;  %2593 = vmatmul.mubr.msk.f32.vlgmr.msra.gmra.mrb[32].mxu1 %vm990_vm0, %v3936_v53  ;;  %v2696_v55 = vpack.c.bf16 %v2956_v56, %v2948_v44  ;;  %1999 = vmatprep.mubr.f32.mxu0 %v4097_v58  ;;  %2977 = vtanh.f32 %v1426_v20 }
 0x1c4   : > { %v2960_v12 = vpop.eup %2959  ;;  %v1517_v29 = vadd.f32 %v1516_v48, %v3893_v3  ;;  %v2686_v10 = vpack.c.bf16 %v2958_v61, %v2950_v38  ;;  %2070 = vmatprep.mubr.f32.mxu1 %v4097_v58  ;;  %2979 = vtanh.f32 %v1515_v41  ;;  %v1431_v0 = vpop.f32.mrb[18].mxu0 }
 0x1c5   : > { %v2962_v63 = vpop.eup %2961  ;;  %v2694_v43 = vpack.c.bf16 %v2960_v12, %v2952_v57  ;;  %2981 = vtanh.f32 %v1428_v36  ;;  %v1432_v33 = vadd.f32 %v1431_v0, %v3897_v59  ;;  %v1520_v15 = vpop.f32.mrb[18].mxu1 }
 0x1c6   : > { %v2964_v60 = vpop.eup %2963  ;;  %v1433_v34 = vpop.f32.mrb[19].mxu0  ;;  %2687 = vmatprep.subr.bf16.mxu0 %v2686_v10  ;;  %2983 = vtanh.f32 %v1517_v29  ;;  %v1521_v45 = vadd.f32 %v1520_v15, %v3897_v59 }
 0x1c7   : > { %v2966_v2 = vpop.eup %2965  ;;  %v1434_v21 = vadd.f32 %v1433_v34, %v3897_v59  ;;  %v1522_v28 = vpop.f32.mrb[19].mxu1  ;;  %2695 = vmatprep.subr.bf16.mxu1 %v2694_v43  ;;  %2689 = vmatpush1.bf16.msra.mxu0 %v2688_v25  ;;  %2985 = vtanh.f32 %v1432_v33 }
 0x1c8   : > { %v2968_v49 = vpop.eup %2967  ;;  %v1523_v32 = vadd.f32 %v1522_v28, %v3897_v59  ;;  %2697 = vmatpush1.bf16.msra.mxu1 %v2696_v55  ;;  %2987 = vtanh.f32 %v1521_v45  ;;  %v1437_v27 = vpop.f32.mrb[20].mxu0 }
 0x1c9   : > { %v2970_v1 = vpop.eup %2969  ;;  %2989 = vtanh.f32 %v1434_v21  ;;  %v1438_v51 = vadd.f32 %v1437_v27, %v3901_v17  ;;  %v1439_v11 = vpop.f32.mrb[21].mxu0 }
 0x1ca   : > { %v2972_v14 = vpop.eup %2971  ;;  %v2700_v5 = vpack.c.bf16 %v2970_v1, %v2964_v60  ;;  %2991 = vtanh.f32 %v1523_v32  ;;  %v1526_v26 = vpop.f32.mrb[20].mxu1  ;;  %v1440_v13 = vadd.f32 %v1439_v11, %v3901_v17 }
 0x1cb   : > { %v2974_v35 = vpop.eup %2973  ;;  %v2692_v52 = vpack.c.bf16 %v2972_v14, %v2962_v63  ;;  %2993 = vtanh.f32 %v1438_v51  ;;  %v1527_v23 = vadd.f32 %v1526_v26, %v3901_v17  ;;  %v1528_v22 = vpop.f32.mrb[21].mxu1 }
 0x1cc   : > { %v2976_v47 = vpop.eup %2975  ;;  %v2690_v8 = vpack.c.bf16 %v2974_v35, %v2966_v2  ;;  %2995 = vtanh.f32 %v1440_v13  ;;  %v1529_v9 = vadd.f32 %v1528_v22, %v3901_v17  ;;  %v1443_v30 = vpop.f32.mrb[22].mxu0 }
 0x1cd   : > { %v2698_v39 = vpack.c.bf16 %v2976_v47, %v2968_v49  ;;  %v2978_v4 = vpop.eup %2977  ;;  %2997 = vtanh.f32 %v1527_v23  ;;  %v1444_v54 = vadd.f32 %v1443_v30, %v3911_v42  ;;  %v1445_v40 = vpop.f32.mrb[23].mxu0 }
 0x1ce   : > { %2691 = vmatprep.subr.bf16.mxu0 %v2690_v8  ;;  %v2980_v24 = vpop.eup %2979  ;;  %2999 = vtanh.f32 %v1529_v9  ;;  %v1532_v31 = vpop.f32.mrb[22].mxu1  ;;  %v1446_v50 = vadd.f32 %v1445_v40, %v3911_v42 }
 0x1cf   : > { %2699 = vmatprep.subr.bf16.mxu1 %v2698_v39  ;;  %2693 = vmatpush1.bf16.msra.mxu0 %v2692_v52  ;;  %v2982_v44 = vpop.eup %2981  ;;  %3001 = vtanh.f32 %v1444_v54  ;;  %v1533_v7 = vadd.f32 %v1532_v31, %v3911_v42  ;;  %v1534_v16 = vpop.f32.mrb[23].mxu1 }
 0x1d0   : > { %2701 = vmatpush1.bf16.msra.mxu1 %v2700_v5  ;;  %v2984_v37 = vpop.eup %2983  ;;  %3003 = vtanh.f32 %v1446_v50  ;;  %v1535_v38 = vadd.f32 %v1534_v16, %v3911_v42 }
 0x1d1   : > { %v2986_v19 = vpop.eup %2985  ;;  %3005 = vtanh.f32 %v1533_v7 }
 0x1d2   : > { %2594 = vmatmul.mubr.msk.f32.vlgmr.msra.gmra.mrb[34].mxu0 %vm990_vm0, %v3936_v53  ;;  %v2988_v57 = vpop.eup %2987  ;;  %3007 = vtanh.f32 %v1535_v38  ;;  %v2704_v18 = vpack.c.bf16 %v2986_v19, %v2978_v4 }
 0x1d3   : > { %2595 = vmatmul.mubr.msk.f32.vlgmr.msra.gmra.mrb[34].mxu1 %vm990_vm0, %v3936_v53  ;;  %2141 = vmatprep.mubr.f32.mxu0 %v4097_v58  ;;  %v2990_v46 = vpop.eup %2989  ;;  %v2712_v56 = vpack.c.bf16 %v2988_v57, %v2980_v24 }
 0x1d4   : > { %2212 = vmatprep.mubr.f32.mxu1 %v4097_v58  ;;  %v2992_v20 = vpop.eup %2991  ;;  %v2702_v6 = vpack.c.bf16 %v2990_v46, %v2982_v44 }
 0x1d5   : > { %v2994_v62 = vpop.eup %2993  ;;  %v1603_v25 = vpop.f32.mrb[24].mxu0  ;;  %v2710_v61 = vpack.c.bf16 %v2992_v20, %v2984_v37 }
 0x1d6   : > { %v2996_v41 = vpop.eup %2995  ;;  %v1604_v36 = vadd.f32 %v1603_v25, %v3893_v3  ;;  %v1605_v48 = vpop.f32.mrb[25].mxu0  ;;  %2703 = vmatprep.subr.bf16.mxu0 %v2702_v6 }
 0x1d7   : > { %v2998_v55 = vpop.eup %2997  ;;  %v1606_v12 = vadd.f32 %v1605_v48, %v3893_v3  ;;  %2711 = vmatprep.subr.bf16.mxu1 %v2710_v61  ;;  %2705 = vmatpush1.bf16.msra.mxu0 %v2704_v18  ;;  %v1692_v10 = vpop.f32.mrb[24].mxu1 }
 0x1d8   : > { %v3000_v29 = vpop.eup %2999  ;;  %2713 = vmatpush1.bf16.msra.mxu1 %v2712_v56  ;;  %3009 = vtanh.f32 %v1604_v36  ;;  %v1693_v0 = vadd.f32 %v1692_v10, %v3893_v3  ;;  %v1694_v43 = vpop.f32.mrb[25].mxu1 }
 0x1d9   : > { %v3002_v63 = vpop.eup %3001  ;;  %v1609_v60 = vpop.f32.mrb[26].mxu0  ;;  %3011 = vtanh.f32 %v1606_v12  ;;  %v1695_v15 = vadd.f32 %v1694_v43, %v3893_v3 }
 0x1da   : > { %v3004_v33 = vpop.eup %3003  ;;  %v1610_v34 = vadd.f32 %v1609_v60, %v3897_v59  ;;  %v1611_v2 = vpop.f32.mrb[27].mxu0  ;;  %v2708_v45 = vpack.c.bf16 %v3002_v63, %v2994_v62  ;;  %3013 = vtanh.f32 %v1693_v0  ;;  %v4106_v63 = vld [vmem:[#allocation7_spill] sm:$0xff] }
 0x1db   : > { %v3006_v21 = vpop.eup %3005  ;;  %v1612_v28 = vadd.f32 %v1611_v2, %v3897_v59  ;;  %v2706_v49 = vpack.c.bf16 %v3004_v33, %v2996_v41  ;;  %3015 = vtanh.f32 %v1695_v15  ;;  %v1698_v1 = vpop.f32.mrb[26].mxu1 }
 0x1dc   : > { %v3008_v32 = vpop.eup %3007  ;;  %v2716_v27 = vpack.c.bf16 %v3006_v21, %v2998_v55  ;;  %3017 = vtanh.f32 %v1610_v34  ;;  %v1699_v14 = vadd.f32 %v1698_v1, %v3897_v59  ;;  %v1700_v51 = vpop.f32.mrb[27].mxu1  ;;  %v3108_v55 = vmov 1966171168  }
 0x1dd   : > { %v1615_v11 = vpop.f32.mrb[28].mxu0  ;;  %2707 = vmatprep.subr.bf16.mxu0 %v2706_v49  ;;  %v2714_v3 = vpack.c.bf16 %v3008_v32, %v3000_v29  ;;  %3019 = vtanh.f32 %v1612_v28  ;;  %v1701_v5 = vadd.f32 %v1700_v51, %v3897_v59  ;;  %v2382_v12 = vunpack.c.l.s4 %v3108_v55  ;;  %v1784_v29 = vpop.permute.xlu0 %1783 }
 0x1de   : > { %v1616_v35 = vadd.f32 %v1615_v11, %v3901_v17  ;;  %v1617_v26 = vpop.f32.mrb[29].mxu0  ;;  %2709 = vmatpush1.bf16.msra.mxu0 %v2708_v45  ;;  %3021 = vtanh.f32 %v1699_v14  ;;  %v1789_v0 = vrot.slane %v1784_v29, %v4106_v63  ;;  %v4107_v45 = vld [vmem:[#allocation6_spill] sm:$0xff] }
 0x1df   : > { %v1618_v13 = vadd.f32 %v1617_v26, %v3901_v17  ;;  %2715 = vmatprep.subr.bf16.mxu1 %v2714_v3  ;;  %3023 = vtanh.f32 %v1701_v5  ;;  %v1704_v52 = vpop.f32.mrb[28].mxu1  ;;  %v2383_v10 = vunpack.c.0.s8 %v2382_v12 }
 0x1e0   : > { %2717 = vmatpush1.bf16.msra.mxu1 %v2716_v27  ;;  %3025 = vtanh.f32 %v1616_v35  ;;  %v1705_v47 = vadd.f32 %v1704_v52, %v3901_v17  ;;  %v1706_v23 = vpop.f32.mrb[29].mxu1 }
 0x1e1   : > { %v1621_v22 = vpop.f32.mrb[30].mxu0  ;;  %2596 = vmatmul.mubr.msk.f32.vlgmr.msra.gmra.mrb[36].mxu0 %vm990_vm0, %v3936_v53  ;;  %3027 = vtanh.f32 %v1618_v13  ;;  %v1707_v59 = vadd.f32 %v1706_v23, %v3901_v17  ;;  %v2386_v21 = vsub.s32 %v2383_v10, %v4107_v45 }
 0x1e2   : > { %v1622_v8 = vadd.f32 %v1621_v22, %v3911_v42  ;;  %v1623_v9 = vpop.f32.mrb[31].mxu0  ;;  %2283 = vmatprep.mubr.f32.mxu0 %v4097_v58  ;;  %v3010_v30 = vpop.eup %3009  ;;  %3029 = vtanh.f32 %v1705_v47 }
 0x1e3   : > { %v1624_v39 = vadd.f32 %v1623_v9, %v3911_v42  ;;  %2597 = vmatmul.mubr.msk.f32.vlgmr.msra.gmra.mrb[36].mxu1 %vm990_vm0, %v3936_v53  ;;  %v3012_v4 = vpop.eup %3011  ;;  %3031 = vtanh.f32 %v1707_v59  ;;  %v1710_v54 = vpop.f32.mrb[30].mxu1 }
 0x1e4   : > { %2354 = vmatprep.mubr.f32.mxu1 %v4097_v58  ;;  %v3014_v40 = vpop.eup %3013  ;;  %3033 = vtanh.f32 %v1622_v8  ;;  %v1711_v17 = vadd.f32 %v1710_v54, %v3911_v42  ;;  %v1712_v24 = vpop.f32.mrb[31].mxu1 }
 0x1e5   : > { %v3016_v31 = vpop.eup %3015  ;;  %3035 = vtanh.f32 %v1624_v39  ;;  %v1713_v50 = vadd.f32 %v1712_v24, %v3911_v42 }
 0x1e6   : > { %v3018_v44 = vpop.eup %3017  ;;  %3037 = vtanh.f32 %v1711_v17 }
 0x1e7   : > { %v3020_v7 = vpop.eup %3019  ;;  %3039 = vtanh.f32 %v1713_v50  ;;  %v2720_v16 = vpack.c.bf16 %v3018_v44, %v3010_v30 }
 0x1e8   : > { %v3022_v37 = vpop.eup %3021  ;;  %v2718_v38 = vpack.c.bf16 %v3020_v7, %v3012_v4 }
 0x1e9   : > { %v3024_v19 = vpop.eup %3023  ;;  %v2728_v57 = vpack.c.bf16 %v3022_v37, %v3014_v40 }
 0x1ea   : > { %v3026_v18 = vpop.eup %3025  ;;  %2719 = vmatprep.subr.bf16.mxu0 %v2718_v38  ;;  %v2726_v58 = vpack.c.bf16 %v3024_v19, %v3016_v31 }
 0x1eb   : > { %v3028_v46 = vpop.eup %3027  ;;  %2721 = vmatpush1.bf16.msra.mxu0 %v2720_v16 }
 0x1ec   : > { %v3030_v56 = vpop.eup %3029  ;;  %2727 = vmatprep.subr.bf16.mxu1 %v2726_v58 }
 0x1ed   : > { %v3032_v20 = vpop.eup %3031  ;;  %2729 = vmatpush1.bf16.msra.mxu1 %v2728_v57 }
 0x1ee   : > { %v3034_v6 = vpop.eup %3033 }
 0x1ef   : > { %v3036_v42 = vpop.eup %3035  ;;  %v2724_v62 = vpack.c.bf16 %v3034_v6, %v3026_v18 }
 0x1f0   : > { %v3038_v25 = vpop.eup %3037  ;;  %v2722_v61 = vpack.c.bf16 %v3036_v42, %v3028_v46 }
 0x1f1   : > { %v3040_v41 = vpop.eup %3039  ;;  %v2732_v36 = vpack.c.bf16 %v3038_v25, %v3030_v56 }
 0x1f2   : > { %2723 = vmatprep.subr.bf16.mxu0 %v2722_v61  ;;  %v2730_v48 = vpack.c.bf16 %v3040_v41, %v3032_v20 }
 0x1f3   : > { %2725 = vmatpush1.bf16.msra.mxu0 %v2724_v62 }
 0x1f4   : > { %2731 = vmatprep.subr.bf16.mxu1 %v2730_v48 }
 0x1f5   : > { %2733 = vmatpush1.bf16.msra.mxu1 %v2732_v36 }
 0x1f6   : > { %2598 = vmatmul.mubr.msk.f32.vlgmr.msra.gmra.mrb[38].mxu0 %vm990_vm0, %v3936_v53 }
 0x1f8   : > { %2599 = vmatmul.mubr.msk.f32.vlgmr.msra.gmra.mrb[38].mxu1 %vm990_vm0, %v3936_v53 }
 0x295   : > { %v1859_v43 = vpop.f32.mrb[32].mxu0 }
 0x296   : > { %v1860_v60 = vadd.f32 %v1859_v43, %v1789_v0  ;;  %v1930_v33 = vpop.f32.mrb[32].mxu1  ;;  %v1861_v15 = vpop.f32.mrb[33].mxu0 }
 0x297   : > { %v1931_v34 = vadd.f32 %v1930_v33, %v1789_v0  ;;  %v1862_v2 = vadd.f32 %v1861_v15, %v1789_v0  ;;  %v1932_v28 = vpop.f32.mrb[33].mxu1 }
 0x298   : > { %v1933_v49 = vadd.f32 %v1932_v28, %v1789_v0 }
 0x299   : > { %v2377_v32 = vcombine.low %v1860_v60, %v1862_v2 }
 0x29a   : > { %v2378_v1 = vcombine.low %v1931_v34, %v1933_v49 }
 0x29b   : > { %v2387_v53 = vrot.slane %v2377_v32, %v2386_v21 }
 0x29c   : > { %v2394_v27 = vrot.slane %v2378_v1, %v2386_v21 }
 0x29e   : > { %v2409_v14 = vcombine.low %v2387_v53, %v2394_v27 }
 0x2a0   : > { %v2417_v9 = vrot.slane %v2409_v14, %v2386_v21 }
 0x2a5   : > { %v2001_v51 = vpop.f32.mrb[34].mxu0 }
 0x2a6   : > { %v2002_v11 = vadd.f32 %v2001_v51, %v1789_v0  ;;  %v2072_v3 = vpop.f32.mrb[34].mxu1  ;;  %v2003_v5 = vpop.f32.mrb[35].mxu0 }
 0x2a7   : > { %v2073_v35 = vadd.f32 %v2072_v3, %v1789_v0  ;;  %v2004_v26 = vadd.f32 %v2003_v5, %v1789_v0  ;;  %v2074_v13 = vpop.f32.mrb[35].mxu1 }
 0x2a8   : > { %v2075_v52 = vadd.f32 %v2074_v13, %v1789_v0 }
 0x2a9   : > { %v2379_v47 = vcombine.low %v2002_v11, %v2004_v26 }
 0x2aa   : > { %v2380_v23 = vcombine.low %v2073_v35, %v2075_v52 }
 0x2ab   : > { %v2401_v22 = vrot.slane %v2379_v47, %v2386_v21 }
 0x2ac   : > { %v2408_v59 = vrot.slane %v2380_v23, %v2386_v21 }
 0x2ae   : > { %v2410_v8 = vcombine.low %v2401_v22, %v2408_v59 }
 0x2b0   : > { %v2424_v30 = vrot.slane %v2410_v8, %v2386_v21 }
 0x2b2   : > { %v2425_v39 = vcombine.low %v2417_v9, %v2424_v30 }
 0x2b4   : > { %2477 = vst [vmem:[%s3997_s25] sm:$0xff] %v2425_v39  ;;  %v2143_v4 = vpop.f32.mrb[36].mxu0 }
 0x2b5   : > { %v2144_v54 = vadd.f32 %v2143_v4, %v1789_v0  ;;  %v2145_v40 = vpop.f32.mrb[37].mxu0 }
 0x2b6   : > { %v2214_v17 = vpop.f32.mrb[36].mxu1  ;;  %v2146_v24 = vadd.f32 %v2145_v40, %v1789_v0 }
 0x2b7   : > { %v2215_v31 = vadd.f32 %v2214_v17, %v1789_v0  ;;  %v2216_v50 = vpop.f32.mrb[37].mxu1 }
 0x2b8   : > { %v2426_v44 = vcombine.low %v2144_v54, %v2146_v24  ;;  %v2217_v7 = vadd.f32 %v2216_v50, %v1789_v0 }
 0x2ba   : > { %v2436_v16 = vrot.slane %v2426_v44, %v2386_v21  ;;  %v2427_v37 = vcombine.low %v2215_v31, %v2217_v7 }
 0x2bc   : > { %v2443_v38 = vrot.slane %v2427_v37, %v2386_v21 }
 0x2be   : > { %v2458_v19 = vcombine.low %v2436_v16, %v2443_v38 }
 0x2c0   : > { %v2466_v48 = vrot.slane %v2458_v19, %v2386_v21 }
 0x2c9   : > { %v2285_v57 = vpop.f32.mrb[38].mxu0 }
 0x2ca   : > { %v2286_v18 = vadd.f32 %v2285_v57, %v1789_v0  ;;  %v2287_v58 = vpop.f32.mrb[39].mxu0 }
 0x2cb   : > { %v2356_v46 = vpop.f32.mrb[38].mxu1  ;;  %v2288_v56 = vadd.f32 %v2287_v58, %v1789_v0 }
 0x2cc   : > { %v2357_v20 = vadd.f32 %v2356_v46, %v1789_v0  ;;  %v2358_v6 = vpop.f32.mrb[39].mxu1 }
 0x2cd   : > { %v2428_v42 = vcombine.low %v2286_v18, %v2288_v56  ;;  %v2359_v62 = vadd.f32 %v2358_v6, %v1789_v0 }
 0x2cf   : > { %v2450_v25 = vrot.slane %v2428_v42, %v2386_v21  ;;  %v2429_v61 = vcombine.low %v2357_v20, %v2359_v62 }
 0x2d1   : > { %v2457_v41 = vrot.slane %v2429_v61, %v2386_v21 }
 0x2d3   : > { %v2459_v36 = vcombine.low %v2450_v25, %v2457_v41 }
 0x2d5   : > { %v2473_v55 = vrot.slane %v2459_v36, %v2386_v21 }
 0x2d7   : > { %v2474_v12 = vcombine.low %v2466_v48, %v2473_v55 }
 0x2d9   : > { %2478 = vst [vmem:[%s3997_s25 + $0x8] sm:$0xff] %v2474_v12 }
 0x2da   : > { %3054 = shalt.err (!%p3051_p3)
}
 0x2db   : > { %s3055_s20 = scalar_lea.hbm %s4005_s15, 256  ;;  %s3059_s23 = scalar_lea.hbm %s4057_s7, 512 }
 0x2dc   : > { %p3056_p4 = scmp.ne.s32.totalorder %s4005_s15, %s3055_s20  ;;  %p3060_p9 = scmp.lt.u32.totalorder %s4005_s15, %s4057_s7 }
 0x2dd   : > { %p3061_p10 = scmp.lt.u32.totalorder %s3059_s23, %s3055_s20  ;;  %p3063_p12 = scmp.lt.u32.totalorder %s3055_s20, %s4005_s15 }
 0x2de   : > { %p3057_p7 = pnand %p3056_p4, %p3191_p5 }
 0x2df   : > { %p3062_p11 = por %p3061_p10, %p3060_p9 }
 0x2e0   : > { %p3058_p8 = pneg %p3057_p7 }
 0x2e1   : > { %p3064_p13 = por %p3063_p12, %p3062_p11 }
 0x2e3   : > { %p3065_p0 = pnand %p3064_p13, %p3058_p8 }
 0x2e5   : > { %3068 = shalt.err (!%p3065_p0)
}
 0x2e6   : > { %2734 = dma.vmem_to_hbm [thread:$0]  (%p3191_p5), %s4007_s9, 256, %s4005_s15, %s2480_s16  }
 0x2e7 PF: > { %p2740_p1 = scmp.ge.s32.totalorder %s3103_s29, 2  ;;  %s2506_s30 = sand.u32 1, %s3091_s26  }
 0x2e8   : > { %s2507_s10 = scalar_lea.sflag [#allocation4], %s2506_s30 }
 0x2e9   : > { %p2737_p2 = pnand %p2740_p1, %p3195_p6 }
 0x2eb   : > { %3086 = dma.done.wait (!%p2737_p2), %s2507_s10, 256  }
 0x2ec   : > { %3088 = vsyncadd (!%p2737_p2), %s2507_s10, 4294967040  ;;  %p19_p3 = scmp.ge.s32.totalorder %s3178_s8, 4   ;;  %s4108_s26 = smov %s3095_s27 }
 0x2ed   : > { %s4109_s27 = smov %s3099_s28  ;;  %s4110_s28 = smov %s3189_s11 }
 0x2ee   : > { %s4111_s29 = smov %s3178_s8  ;;  %21 = sbr.rel (!%p19_p3) target bundleno = 6 (0x6), region = 83 }
 0x2f5   :  { %2512 = vsyncpa [#allocation4], 1 }
 0x2f6   :  { %2514 = vsyncpa [#allocation4 + $0x1], 1 }

</bundles_post_ra>
